<compile_context>
chip_gen: v7x
topology: tpu7x:2x2x1
jax: 0.10.0
libtpu: 0.0.40
codegen_flags: <defaults>
</compile_context>

<pallas_src>
import jax
import jax.numpy as jnp
from jax.experimental import pallas as pl
from jax.experimental.pallas import tpu as pltpu


# ----------------------------------------------------------------------------
# Pallas kernels
# ----------------------------------------------------------------------------

def _conv_mm_kernel(w_ref, p_ref, b_ref, o_ref):
    """(Cout, K) bf16 @ (K, TILE) bf16 -> f32 accum, + bias, ReLU.

    TILE is a multiple of 128 -> unmasked lane-dense stores.
    """
    acc = jnp.dot(w_ref[...], p_ref[...], preferred_element_type=jnp.float32)
    o_ref[...] = jnp.maximum(acc + b_ref[...], 0.0)


def _grader_kernel(cat_ref, xcol_ref, upw_ref, upb_ref, hw_ref, hb_ref, o_ref):
    """Fused update-net + depthwise xcorr + (loc|cls2|cls3) heads, per batch.

    cat_ref : (3C, Sz)    f32   [zf ; uf ; zf0] template features, Sz = Hz*Wz
    xcol_ref: (P, C, Qp)  f32   im2col'ed search features, P = Hz*Wz,
                                Qp = Ho*Wo padded to a multiple of 128
    upw_ref : (C, 3C)     bf16  update-net 1x1 conv weight
    upb_ref : (C, 1)      f32   update-net bias
    hw_ref  : (8, C)      bf16  [loc(4); cls2(2); cls3(1); pad(1)] head weights
    hb_ref  : (8, 1)      f32   head biases (padded)
    o_ref   : (8, Qp)     f32   fused head outputs (lane-dense)
    """
    C = upw_ref.shape[0]
    P = xcol_ref.shape[0]

    cat = cat_ref[...]                                   # (3C, Sz) f32
    zf = cat[:C, :]                                      # residual branch, f32

    # update-net: 1x1 conv over concatenated features + residual + ReLU (MXU).
    upd = jnp.dot(upw_ref[...], cat.astype(jnp.bfloat16),
                  preferred_element_type=jnp.float32)    # (C, Sz) f32
    upd = jnp.maximum(upd + upb_ref[...] + zf, 0.0)      # update_f, f32

    # depthwise cross-correlation:
    #   corr[c, q] = sum_p xcol[p, c, q] * upd[c, p]
    # aligned full-plane loads + lane-broadcast columns; pure f32 VPU work
    # (one (C, Qp) vreg FMA per static p).
    acc = xcol_ref[0] * upd[:, 0:1]
    for p in range(1, P):                                # static unroll (P=36)
        acc = acc + xcol_ref[p] * upd[:, p:p + 1]

    # fused 1x1 heads on the correlation map (single padded weight slab, MXU).
    heads = jnp.dot(hw_ref[...], acc.astype(jnp.bfloat16),
                    preferred_element_type=jnp.float32)  # (8, Qp) f32
    o_ref[...] = heads + hb_ref[...]


# ----------------------------------------------------------------------------
# Pallas wrappers
# ----------------------------------------------------------------------------

def _conv3x3_pallas(patches, w2, bias, *, lane_tile):
    """patches: (K, L) bf16, L % lane_tile == 0, K % 8 == 0;
    w2: (Cout, K) bf16; bias: (Cout,) f32."""
    K, L = patches.shape
    Cout = w2.shape[0]
    grid = (L // lane_tile,)
    return pl.pallas_call(
        _conv_mm_kernel,
        out_shape=jax.ShapeDtypeStruct((Cout, L), jnp.float32),
        grid=grid,
        in_specs=[
            pl.BlockSpec((Cout, K), lambda i: (0, 0)),
            pl.BlockSpec((K, lane_tile), lambda i: (0, i)),
            pl.BlockSpec((Cout, 1), lambda i: (0, 0)),
        ],
        out_specs=pl.BlockSpec((Cout, lane_tile), lambda i: (0, i)),
        compiler_params=pltpu.CompilerParams(
            dimension_semantics=("parallel",)),
    )(w2, patches, bias.reshape(Cout, 1).astype(jnp.float32))


def _grader_pallas(cat, xcol, up_w, up_b, head_w, head_b):
    """cat: (B, 3C, Sz); xcol: (B, P, C, Qp); returns (B, 8, Qp) fused heads."""
    B, C3, Sz = cat.shape
    P, C, Qp = xcol.shape[1], xcol.shape[2], xcol.shape[3]
    H = head_w.shape[0]
    return pl.pallas_call(
        _grader_kernel,
        out_shape=jax.ShapeDtypeStruct((B, H, Qp), jnp.float32),
        grid=(B,),
        in_specs=[
            pl.BlockSpec((None, C3, Sz), lambda b: (b, 0, 0)),
            pl.BlockSpec((None, P, C, Qp), lambda b: (b, 0, 0, 0)),
            pl.BlockSpec((C, C3), lambda b: (0, 0)),
            pl.BlockSpec((C, 1), lambda b: (0, 0)),
            pl.BlockSpec((H, C), lambda b: (0, 0)),
            pl.BlockSpec((H, 1), lambda b: (0, 0)),
        ],
        out_specs=pl.BlockSpec((None, H, Qp), lambda b: (b, 0, 0)),
        compiler_params=pltpu.CompilerParams(
            dimension_semantics=("parallel",)),
    )(cat.astype(jnp.float32), xcol.astype(jnp.float32),
      up_w.astype(jnp.bfloat16), up_b.reshape(C, 1).astype(jnp.float32),
      head_w.astype(jnp.bfloat16), head_b.reshape(H, 1).astype(jnp.float32))


# ----------------------------------------------------------------------------
# Host-side layout plumbing (free XLA work)
# ----------------------------------------------------------------------------

def _im2col3x3_cmajor(x):
    """x: (N, Cin, H, W) -> patches (Cin*9, N*Ho*Wo) with K order = (c, ky, kx)
    (matches w.reshape(Cout, Cin*9)) and lane order n*(Ho*Wo) + y*Wo + xx."""
    N, Cin, H, W = x.shape
    Ho, Wo = H - 2, W - 2
    cols = []
    for ky in range(3):
        for kx in range(3):
            cols.append(x[:, :, ky:ky + Ho, kx:kx + Wo])
    p = jnp.stack(cols, axis=2)                      # (N, Cin, 9, Ho, Wo)
    p = jnp.transpose(p, (1, 2, 0, 3, 4))            # (Cin, 9, N, Ho, Wo)
    return p.reshape(Cin * 9, N * Ho * Wo), Ho, Wo


def _round_up(x, m):
    return (x + m - 1) // m * m


# ----------------------------------------------------------------------------
# Model
# ----------------------------------------------------------------------------

class ModelBuilderTCTrackPallas:
    """Stand-in for ModelBuilder_tctrack.forward (training path), on Pallas.

    TODO(synk): TemporalAlexNet / get_update_feat / TcT internals are external
    to the provided source; stand-ins = 3x3-conv backbone, 1x1-conv residual
    update-net, depthwise-xcorr + 1x1-head grader (fused Pallas kernels).
    """

    def __init__(self, key, cin=3, cfeat=8, videorangemax=3):
        assert videorangemax == 3, "temporal window assumes videorangemax == 3"
        self.cin, self.cfeat, self.videorangemax = cin, cfeat, videorangemax
        k = jax.random.split(key, 10)
        s = 0.1
        # backbone: 3x3 conv cin -> cfeat, ReLU
        self.bb_w = s * jax.random.normal(k[0], (cfeat, cin, 3, 3), jnp.float32)
        self.bb_b = s * jax.random.normal(k[1], (cfeat,), jnp.float32)
        # update-net: 1x1 conv 3*cfeat -> cfeat, + zf residual, ReLU
        self.up_w = s * jax.random.normal(k[2], (cfeat, 3 * cfeat), jnp.float32)
        self.up_b = s * jax.random.normal(k[3], (cfeat,), jnp.float32)
        # grader heads: 1x1 convs on the depthwise-xcorr response
        self.loc_w = s * jax.random.normal(k[4], (4, cfeat), jnp.float32)
        self.loc_b = s * jax.random.normal(k[5], (4,), jnp.float32)
        self.cls2_w = s * jax.random.normal(k[6], (2, cfeat), jnp.float32)
        self.cls2_b = s * jax.random.normal(k[7], (2,), jnp.float32)
        self.cls3_w = s * jax.random.normal(k[8], (1, cfeat), jnp.float32)
        self.cls3_b = s * jax.random.normal(k[9], (1,), jnp.float32)
        # fused head weights, padded to 8 sublanes (loc 4 + cls2 2 + cls3 1 + pad)
        n_head = 4 + 2 + 1
        pad = (-n_head) % 8
        self.head_w = jnp.concatenate(
            [self.loc_w, self.cls2_w, self.cls3_w,
             jnp.zeros((pad, cfeat), jnp.float32)], axis=0)       # (8, cfeat)
        self.head_b = jnp.concatenate(
            [self.loc_b, self.cls2_b, self.cls3_b,
             jnp.zeros((pad,), jnp.float32)], axis=0)             # (8,)

    # --- fused backbone (TemporalAlexNet stand-in) ----------------------------
    def _backbone_all(self, template, update, frames):
        """One fused Pallas conv over template + update + all presearch frames."""
        B = template.shape[0]
        NT = frames.shape[0]
        C = self.cfeat
        zu = jnp.concatenate([template, update], axis=0)          # (2B, Cin, 8, 8)
        p_zu, hz, wz = _im2col3x3_cmajor(zu)                      # (K, 2B*36)
        p_fr, hx, wx = _im2col3x3_cmajor(frames)                  # (K, NT*196)
        patches = jnp.concatenate([p_zu, p_fr], axis=1)           # (K, L)
        K, L = patches.shape

        # lane padding: 2 tiles (>= 2 parallel grid steps for v7x's 2 TCs),
        # each a multiple of 128 lanes -> unmasked stores.
        n_tiles = 2
        lane_tile = _round_up((L + n_tiles - 1) // n_tiles, 128)
        l_pad = lane_tile * n_tiles
        # sublane padding: contraction dim 27 -> 32 (zero rows, compute-neutral).
        k_pad = _round_up(K, 8)
        patches = jnp.pad(patches, ((0, k_pad - K), (0, l_pad - L)))

        w2 = jnp.pad(self.bb_w.reshape(C, K), ((0, 0), (0, k_pad - K)))
        feat = _conv3x3_pallas(patches.astype(jnp.bfloat16),
                               w2.astype(jnp.bfloat16),
                               self.bb_b, lane_tile=lane_tile)

        # split the lane-packed features back out (free XLA slicing/reshapes).
        zl, xl = hz * wz, hx * wx
        zu_f = feat[:, :2 * B * zl].reshape(C, 2 * B, zl)
        zf = jnp.transpose(zu_f[:, :B], (1, 0, 2))                # (B, C, zl)
        uf = jnp.transpose(zu_f[:, B:2 * B], (1, 0, 2))           # (B, C, zl)
        T = NT // B
        off = 2 * B * zl
        fr_f = feat[:, off:off + NT * xl].reshape(C, B, T, hx, wx)
        xf = jnp.transpose(fr_f[:, :, T - 1], (1, 0, 2, 3))       # (B, C, hx, wx)
        return zf, uf, xf, (hz, wz)

    # --- fused grader (update-net + xcorr + heads) ----------------------------
    def _grader(self, xf, zf, uf, zf0, zhw):
        B, C, Hx, Wx = xf.shape
        Hz, Wz = zhw
        Ho, Wo = Hx - Hz + 1, Wx - Wz + 1
        Q = Ho * Wo
        Qp = _round_up(Q, 128)                                    # lane-dense
        # host-side im2col of the search feature: aligned (P, C, Qp) planes so
        # the kernel never slices at unaligned offsets.
        cols = []
        for ky in range(Hz):
            for kx in range(Wz):
                cols.append(
                    xf[:, :, ky:ky + Ho, kx:kx + Wo].reshape(B, C, Q))
        xcol = jnp.stack(cols, axis=1)                            # (B, P, C, Q)
        xcol = jnp.pad(xcol, ((0, 0), (0, 0), (0, 0), (0, Qp - Q)))
        cat = jnp.concatenate([zf, uf, zf0], axis=1)              # (B, 3C, Hz*Wz)

        out = _grader_pallas(cat, xcol, self.up_w, self.up_b,
                             self.head_w, self.head_b)            # (B, 8, Qp)
        out = out[:, :, :Q]
        loc = out[:, 0:4, :].reshape(B, 4, Ho, Wo)
        cls2 = out[:, 4:6, :].reshape(B, 2, Ho, Wo)
        cls3 = out[:, 6:7, :].reshape(B, 1, Ho, Wo)
        return loc, cls2, cls3

    # --- forward (training path) ----------------------------------------------
    def forward(self, template, update, presearch, search):
        assert self.videorangemax == 3
        presearch = jnp.concatenate(
            [presearch[:, self.videorangemax - 3:], search[:, None]], axis=1)
        B, T, Cin, Hs, Ws = presearch.shape
        frames = presearch.reshape(B * T, Cin, Hs, Ws)

        zf, uf, xf, zhw = self._backbone_all(template, update, frames)
        # TODO(synk): TcT consumes the full temporal feature stack; the stand-in
        # grader uses only the current-frame feature (last presearch frame).
        loc, cls2, cls3 = self._grader(xf, zf, uf, zf, zhw)       # zf0 = zf
        return loc

    # --- pure-JAX reference (identical bf16 rounding of MXU inputs) ----------
    @staticmethod
    def _q(x):
        return x.astype(jnp.bfloat16).astype(jnp.float32)

    def _ref_backbone(self, x):
        hp = jax.lax.Precision.HIGHEST
        out = jax.lax.conv_general_dilated(
            self._q(x), self._q(self.bb_w), (1, 1), 'VALID',
            dimension_numbers=('NCHW', 'OIHW', 'NCHW'), precision=hp)
        return jnp.maximum(out + self.bb_b[None, :, None, None], 0.0)

    def _ref_updatenet(self, zf, uf, zf0):
        hp = jax.lax.Precision.HIGHEST
        cat = jnp.concatenate([zf, uf, zf0], axis=1)
        out = jnp.einsum('oc,bchw->bohw', self._q(self.up_w), self._q(cat),
                         precision=hp)
        return jnp.maximum(out + self.up_b[None, :, None, None] + zf, 0.0)

    @staticmethod
    def _ref_xcorr(x, kernel):
        B, C, Hx, Wx = x.shape
        Hz, Wz = kernel.shape[2], kernel.shape[3]
        Ho, Wo = Hx - Hz + 1, Wx - Wz + 1
        acc = jnp.zeros((B, C, Ho, Wo), jnp.float32)
        for ky in range(Hz):
            for kx in range(Wz):
                acc = acc + (x[:, :, ky:ky + Ho, kx:kx + Wo]
                             * kernel[:, :, ky:ky + 1, kx:kx + 1])
        return acc

    def _ref_head(self, corr, w, b):
        hp = jax.lax.Precision.HIGHEST
        return (jnp.einsum('oc,bchw->bohw', self._q(w), self._q(corr),
                           precision=hp) + b[None, :, None, None])

    def forward_reference(self, template, update, presearch, search):
        presearch = jnp.concatenate(
            [presearch[:, self.videorangemax - 3:], search[:, None]], axis=1)
        B, T, Cin, Hs, Ws = presearch.shape
        zf = self._ref_backbone(template)                         # (B, C, 6, 6)
        uf = self._ref_backbone(update)
        xf_all = self._ref_backbone(presearch.reshape(B * T, Cin, Hs, Ws))
        xf = xf_all.reshape(B, T, self.cfeat, Hs - 2, Ws - 2)[:, -1]
        update_f = self._ref_updatenet(zf, uf, zf)
        corr = self._ref_xcorr(xf, update_f)
        return self._ref_head(corr, self.loc_w, self.loc_b)


# ----------------------------------------------------------------------------
# main
# ----------------------------------------------------------------------------

if __name__ == "__main__":
    key = jax.random.PRNGKey(0)
    kt, ku, kp, ks, kw = jax.random.split(key, 5)

    B = 2
    template = jax.random.normal(kt, (B, 3, 8, 8), jnp.float32)
    update = jax.random.normal(ku, (B, 3, 8, 8), jnp.float32)
    presearch = jax.random.normal(kp, (B, 3, 3, 16, 16), jnp.float32)
    search = jax.random.normal(ks, (B, 3, 16, 16), jnp.float32)

    model = ModelBuilderTCTrackPallas(kw)

    loc = jax.jit(model.forward)(template, update, presearch, search)
    loc = jax.block_until_ready(loc)
    assert loc.shape == (B, 4, 9, 9), loc.shape

    loc_ref = jax.block_until_ready(
        jax.jit(model.forward_reference)(template, update, presearch, search))
    max_err = float(jnp.max(jnp.abs(loc - loc_ref)))
    assert jnp.allclose(loc, loc_ref, atol=5e-3, rtol=5e-3), max_err

    print("KERNEL_OK")
</pallas_src>

<mosaic_0001>
module attributes {stable_mosaic.version = 11 : i64} {
  func.func @_conv_mm_kernel(%arg0: i32, %arg1: memref<8x32xbf16, #tpu.memory_space<vmem>>, %arg2: memref<32x896xbf16, #tpu.memory_space<vmem>>, %arg3: memref<8x1xf32, #tpu.memory_space<vmem>>, %arg4: memref<8x896xf32, #tpu.memory_space<vmem>>) attributes {dimension_semantics = [#tpu.dimension_semantics<parallel>], iteration_bounds = array<i64: 2>, scalar_prefetch = 0 : i64, scratch_operands = 0 : i64, tpu.core_type = #tpu.core_type<tc>, window_params = [{pipeline_mode = #tpu.pipeline_mode<synchronous>, transform_indices = @transform_0, window_bounds = array<i64: 8, 32>}, {transform_indices = @transform_1, window_bounds = array<i64: 32, 896>}, {pipeline_mode = #tpu.pipeline_mode<synchronous>, transform_indices = @transform_2, window_bounds = array<i64: 8, 1>}, {transform_indices = @transform_3, window_bounds = array<i64: 8, 896>}]} {
    %c0 = arith.constant 0 : index
    %c0_0 = arith.constant 0 : index
    %0 = vector.load %arg1[%c0, %c0_0] : memref<8x32xbf16, #tpu.memory_space<vmem>>, vector<8x32xbf16>
    %c0_1 = arith.constant 0 : index
    %c0_2 = arith.constant 0 : index
    %1 = vector.load %arg2[%c0_1, %c0_2] : memref<32x896xbf16, #tpu.memory_space<vmem>>, vector<32x896xbf16>
    %cst = arith.constant dense<0.000000e+00> : vector<8x896xf32>
    %2 = tpu.matmul %0, %1, %cst {dimension_numbers = #tpu.dot_dimension_numbers<[1], [0], [0], [1], [0, 0, 1, 1], [], []>} : vector<8x32xbf16>, vector<32x896xbf16>, vector<8x896xf32> -> vector<8x896xf32>
    %c0_3 = arith.constant 0 : index
    %c0_4 = arith.constant 0 : index
    %3 = vector.load %arg3[%c0_3, %c0_4] : memref<8x1xf32, #tpu.memory_space<vmem>>, vector<8x1xf32>
    %4 = vector.broadcast %3 : vector<8x1xf32> to vector<8x896xf32>
    %5 = arith.addf %2, %4 : vector<8x896xf32>
    %cst_5 = arith.constant 0.000000e+00 : f32
    %6 = vector.broadcast %cst_5 : f32 to vector<8x896xf32>
    %7 = arith.maximumf %5, %6 : vector<8x896xf32>
    %c0_6 = arith.constant 0 : index
    %c0_7 = arith.constant 0 : index
    %8 = vector.load %arg4[%c0_6, %c0_7] : memref<8x896xf32, #tpu.memory_space<vmem>>, vector<8x896xf32>
    tpu.vector_store %arg4[%c0_6, %c0_7], %7 {strides = array<i32>} : memref<8x896xf32, #tpu.memory_space<vmem>>, vector<8x896xf32>,
    return
  }
  func.func @transform_0(%arg0: i32) -> (i32, i32) {
    %c0_i32 = arith.constant 0 : i32
    %c0_i32_0 = arith.constant 0 : i32
    %c0_i32_1 = arith.constant 0 : i32
    return %c0_i32, %c0_i32_0 : i32, i32
  }
  func.func @transform_1(%arg0: i32) -> (i32, i32) {
    %c0_i32 = arith.constant 0 : i32
    %c0_i32_0 = arith.constant 0 : i32
    return %c0_i32, %arg0 : i32, i32
  }
  func.func @transform_2(%arg0: i32) -> (i32, i32) {
    %c0_i32 = arith.constant 0 : i32
    %c0_i32_0 = arith.constant 0 : i32
    %c0_i32_1 = arith.constant 0 : i32
    return %c0_i32, %c0_i32_0 : i32, i32
  }
  func.func @transform_3(%arg0: i32) -> (i32, i32) {
    %c0_i32 = arith.constant 0 : i32
    %c0_i32_0 = arith.constant 0 : i32
    return %c0_i32, %arg0 : i32, i32
  }
}

module attributes {stable_mosaic.version = 11 : i64} {
  func.func @_grader_kernel(%arg0: i32, %arg1: memref<1x24x36xf32, #tpu.memory_space<vmem>>, %arg2: memref<1x36x8x128xf32, #tpu.memory_space<vmem>>, %arg3: memref<8x24xbf16, #tpu.memory_space<vmem>>, %arg4: memref<8x1xf32, #tpu.memory_space<vmem>>, %arg5: memref<8x8xbf16, #tpu.memory_space<vmem>>, %arg6: memref<8x1xf32, #tpu.memory_space<vmem>>, %arg7: memref<1x8x128xf32, #tpu.memory_space<vmem>>) attributes {dimension_semantics = [#tpu.dimension_semantics<parallel>], iteration_bounds = array<i64: 2>, scalar_prefetch = 0 : i64, scratch_operands = 0 : i64, tpu.core_type = #tpu.core_type<tc>, window_params = [{transform_indices = @transform_0, window_bounds = array<i64: 1, 24, 36>}, {transform_indices = @transform_1, window_bounds = array<i64: 1, 36, 8, 128>}, {pipeline_mode = #tpu.pipeline_mode<synchronous>, transform_indices = @transform_2, window_bounds = array<i64: 8, 24>}, {pipeline_mode = #tpu.pipeline_mode<synchronous>, transform_indices = @transform_3, window_bounds = array<i64: 8, 1>}, {pipeline_mode = #tpu.pipeline_mode<synchronous>, transform_indices = @transform_4, window_bounds = array<i64: 8, 8>}, {pipeline_mode = #tpu.pipeline_mode<synchronous>, transform_indices = @transform_5, window_bounds = array<i64: 8, 1>}, {transform_indices = @transform_6, window_bounds = array<i64: 1, 8, 128>}]} {
    %c0 = arith.constant 0 : index
    %c0_0 = arith.constant 0 : index
    %c0_1 = arith.constant 0 : index
    %0 = vector.load %arg1[%c0, %c0_0, %c0_1] : memref<1x24x36xf32, #tpu.memory_space<vmem>>, vector<1x24x36xf32>
    %1 = vector.shape_cast %0 : vector<1x24x36xf32> to vector<24x36xf32>
    %2 = vector.extract_strided_slice %1 {offsets = [0, 0], sizes = [8, 36], strides = [1, 1]} : vector<24x36xf32> to vector<8x36xf32>
    %c0_2 = arith.constant 0 : index
    %c0_3 = arith.constant 0 : index
    %3 = vector.load %arg3[%c0_2, %c0_3] : memref<8x24xbf16, #tpu.memory_space<vmem>>, vector<8x24xbf16>
    %4 = arith.truncf %1 : vector<24x36xf32> to vector<24x36xbf16>
    %cst = arith.constant dense<0.000000e+00> : vector<8x36xf32>
    %5 = tpu.matmul %3, %4, %cst {dimension_numbers = #tpu.dot_dimension_numbers<[1], [0], [0], [1], [0, 0, 1, 1], [], []>} : vector<8x24xbf16>, vector<24x36xbf16>, vector<8x36xf32> -> vector<8x36xf32>
    %c0_4 = arith.constant 0 : index
    %c0_5 = arith.constant 0 : index
    %6 = vector.load %arg4[%c0_4, %c0_5] : memref<8x1xf32, #tpu.memory_space<vmem>>, vector<8x1xf32>
    %7 = vector.broadcast %6 : vector<8x1xf32> to vector<8x36xf32>
    %8 = arith.addf %5, %7 : vector<8x36xf32>
    %9 = arith.addf %8, %2 : vector<8x36xf32>
    %cst_6 = arith.constant 0.000000e+00 : f32
    %10 = vector.broadcast %cst_6 : f32 to vector<8x36xf32>
    %11 = arith.maximumf %9, %10 : vector<8x36xf32>
    %c0_7 = arith.constant 0 : index
    %c0_8 = arith.constant 0 : index
    %c0_9 = arith.constant 0 : index
    %c0_10 = arith.constant 0 : index
    %12 = vector.load %arg2[%c0_7, %c0_8, %c0_9, %c0_10] : memref<1x36x8x128xf32, #tpu.memory_space<vmem>>, vector<1x1x8x128xf32>
    %13 = vector.shape_cast %12 : vector<1x1x8x128xf32> to vector<8x128xf32>
    %14 = vector.extract_strided_slice %11 {offsets = [0, 0], sizes = [8, 1], strides = [1, 1]} : vector<8x36xf32> to vector<8x1xf32>
    %15 = vector.broadcast %14 : vector<8x1xf32> to vector<8x128xf32>
    %16 = arith.mulf %13, %15 : vector<8x128xf32>
    %c0_11 = arith.constant 0 : index
    %c1 = arith.constant 1 : index
    %c0_12 = arith.constant 0 : index
    %c0_13 = arith.constant 0 : index
    %17 = vector.load %arg2[%c0_11, %c1, %c0_12, %c0_13] : memref<1x36x8x128xf32, #tpu.memory_space<vmem>>, vector<1x1x8x128xf32>
    %18 = vector.shape_cast %17 : vector<1x1x8x128xf32> to vector<8x128xf32>
    %19 = vector.extract_strided_slice %11 {offsets = [0, 1], sizes = [8, 1], strides = [1, 1]} : vector<8x36xf32> to vector<8x1xf32>
    %20 = vector.broadcast %19 : vector<8x1xf32> to vector<8x128xf32>
    %21 = arith.mulf %18, %20 : vector<8x128xf32>
    %22 = arith.addf %16, %21 : vector<8x128xf32>
    %c0_14 = arith.constant 0 : index
    %c2 = arith.constant 2 : index
    %c0_15 = arith.constant 0 : index
    %c0_16 = arith.constant 0 : index
    %23 = vector.load %arg2[%c0_14, %c2, %c0_15, %c0_16] : memref<1x36x8x128xf32, #tpu.memory_space<vmem>>, vector<1x1x8x128xf32>
    %24 = vector.shape_cast %23 : vector<1x1x8x128xf32> to vector<8x128xf32>
    %25 = vector.extract_strided_slice %11 {offsets = [0, 2], sizes = [8, 1], strides = [1, 1]} : vector<8x36xf32> to vector<8x1xf32>
    %26 = vector.broadcast %25 : vector<8x1xf32> to vector<8x128xf32>
    %27 = arith.mulf %24, %26 : vector<8x128xf32>
    %28 = arith.addf %22, %27 : vector<8x128xf32>
    %c0_17 = arith.constant 0 : index
    %c3 = arith.constant 3 : index
    %c0_18 = arith.constant 0 : index
    %c0_19 = arith.constant 0 : index
    %29 = vector.load %arg2[%c0_17, %c3, %c0_18, %c0_19] : memref<1x36x8x128xf32, #tpu.memory_space<vmem>>, vector<1x1x8x128xf32>
    %30 = vector.shape_cast %29 : vector<1x1x8x128xf32> to vector<8x128xf32>
    %31 = vector.extract_strided_slice %11 {offsets = [0, 3], sizes = [8, 1], strides = [1, 1]} : vector<8x36xf32> to vector<8x1xf32>
    %32 = vector.broadcast %31 : vector<8x1xf32> to vector<8x128xf32>
    %33 = arith.mulf %30, %32 : vector<8x128xf32>
    %34 = arith.addf %28, %33 : vector<8x128xf32>
    %c0_20 = arith.constant 0 : index
    %c4 = arith.constant 4 : index
    %c0_21 = arith.constant 0 : index
    %c0_22 = arith.constant 0 : index
    %35 = vector.load %arg2[%c0_20, %c4, %c0_21, %c0_22] : memref<1x36x8x128xf32, #tpu.memory_space<vmem>>, vector<1x1x8x128xf32>
    %36 = vector.shape_cast %35 : vector<1x1x8x128xf32> to vector<8x128xf32>
    %37 = vector.extract_strided_slice %11 {offsets = [0, 4], sizes = [8, 1], strides = [1, 1]} : vector<8x36xf32> to vector<8x1xf32>
    %38 = vector.broadcast %37 : vector<8x1xf32> to vector<8x128xf32>
    %39 = arith.mulf %36, %38 : vector<8x128xf32>
    %40 = arith.addf %34, %39 : vector<8x128xf32>
    %c0_23 = arith.constant 0 : index
    %c5 = arith.constant 5 : index
    %c0_24 = arith.constant 0 : index
    %c0_25 = arith.constant 0 : index
    %41 = vector.load %arg2[%c0_23, %c5, %c0_24, %c0_25] : memref<1x36x8x128xf32, #tpu.memory_space<vmem>>, vector<1x1x8x128xf32>
    %42 = vector.shape_cast %41 : vector<1x1x8x128xf32> to vector<8x128xf32>
    %43 = vector.extract_strided_slice %11 {offsets = [0, 5], sizes = [8, 1], strides = [1, 1]} : vector<8x36xf32> to vector<8x1xf32>
    %44 = vector.broadcast %43 : vector<8x1xf32> to vector<8x128xf32>
    %45 = arith.mulf %42, %44 : vector<8x128xf32>
    %46 = arith.addf %40, %45 : vector<8x128xf32>
    %c0_26 = arith.constant 0 : index
    %c6 = arith.constant 6 : index
    %c0_27 = arith.constant 0 : index
    %c0_28 = arith.constant 0 : index
    %47 = vector.load %arg2[%c0_26, %c6, %c0_27, %c0_28] : memref<1x36x8x128xf32, #tpu.memory_space<vmem>>, vector<1x1x8x128xf32>
    %48 = vector.shape_cast %47 : vector<1x1x8x128xf32> to vector<8x128xf32>
    %49 = vector.extract_strided_slice %11 {offsets = [0, 6], sizes = [8, 1], strides = [1, 1]} : vector<8x36xf32> to vector<8x1xf32>
    %50 = vector.broadcast %49 : vector<8x1xf32> to vector<8x128xf32>
    %51 = arith.mulf %48, %50 : vector<8x128xf32>
    %52 = arith.addf %46, %51 : vector<8x128xf32>
    %c0_29 = arith.constant 0 : index
    %c7 = arith.constant 7 : index
    %c0_30 = arith.constant 0 : index
    %c0_31 = arith.constant 0 : index
    %53 = vector.load %arg2[%c0_29, %c7, %c0_30, %c0_31] : memref<1x36x8x128xf32, #tpu.memory_space<vmem>>, vector<1x1x8x128xf32>
    %54 = vector.shape_cast %53 : vector<1x1x8x128xf32> to vector<8x128xf32>
    %55 = vector.extract_strided_slice %11 {offsets = [0, 7], sizes = [8, 1], strides = [1, 1]} : vector<8x36xf32> to vector<8x1xf32>
    %56 = vector.broadcast %55 : vector<8x1xf32> to vector<8x128xf32>
    %57 = arith.mulf %54, %56 : vector<8x128xf32>
    %58 = arith.addf %52, %57 : vector<8x128xf32>
    %c0_32 = arith.constant 0 : index
    %c8 = arith.constant 8 : index
    %c0_33 = arith.constant 0 : index
    %c0_34 = arith.constant 0 : index
    %59 = vector.load %arg2[%c0_32, %c8, %c0_33, %c0_34] : memref<1x36x8x128xf32, #tpu.memory_space<vmem>>, vector<1x1x8x128xf32>
    %60 = vector.shape_cast %59 : vector<1x1x8x128xf32> to vector<8x128xf32>
    %61 = vector.extract_strided_slice %11 {offsets = [0, 8], sizes = [8, 1], strides = [1, 1]} : vector<8x36xf32> to vector<8x1xf32>
    %62 = vector.broadcast %61 : vector<8x1xf32> to vector<8x128xf32>
    %63 = arith.mulf %60, %62 : vector<8x128xf32>
    %64 = arith.addf %58, %63 : vector<8x128xf32>
    %c0_35 = arith.constant 0 : index
    %c9 = arith.constant 9 : index
    %c0_36 = arith.constant 0 : index
    %c0_37 = arith.constant 0 : index
    %65 = vector.load %arg2[%c0_35, %c9, %c0_36, %c0_37] : memref<1x36x8x128xf32, #tpu.memory_space<vmem>>, vector<1x1x8x128xf32>
    %66 = vector.shape_cast %65 : vector<1x1x8x128xf32> to vector<8x128xf32>
    %67 = vector.extract_strided_slice %11 {offsets = [0, 9], sizes = [8, 1], strides = [1, 1]} : vector<8x36xf32> to vector<8x1xf32>
    %68 = vector.broadcast %67 : vector<8x1xf32> to vector<8x128xf32>
    %69 = arith.mulf %66, %68 : vector<8x128xf32>
    %70 = arith.addf %64, %69 : vector<8x128xf32>
    %c0_38 = arith.constant 0 : index
    %c10 = arith.constant 10 : index
    %c0_39 = arith.constant 0 : index
    %c0_40 = arith.constant 0 : index
    %71 = vector.load %arg2[%c0_38, %c10, %c0_39, %c0_40] : memref<1x36x8x128xf32, #tpu.memory_space<vmem>>, vector<1x1x8x128xf32>
    %72 = vector.shape_cast %71 : vector<1x1x8x128xf32> to vector<8x128xf32>
    %73 = vector.extract_strided_slice %11 {offsets = [0, 10], sizes = [8, 1], strides = [1, 1]} : vector<8x36xf32> to vector<8x1xf32>
    %74 = vector.broadcast %73 : vector<8x1xf32> to vector<8x128xf32>
    %75 = arith.mulf %72, %74 : vector<8x128xf32>
    %76 = arith.addf %70, %75 : vector<8x128xf32>
    %c0_41 = arith.constant 0 : index
    %c11 = arith.constant 11 : index
    %c0_42 = arith.constant 0 : index
    %c0_43 = arith.constant 0 : index
    %77 = vector.load %arg2[%c0_41, %c11, %c0_42, %c0_43] : memref<1x36x8x128xf32, #tpu.memory_space<vmem>>, vector<1x1x8x128xf32>
    %78 = vector.shape_cast %77 : vector<1x1x8x128xf32> to vector<8x128xf32>
    %79 = vector.extract_strided_slice %11 {offsets = [0, 11], sizes = [8, 1], strides = [1, 1]} : vector<8x36xf32> to vector<8x1xf32>
    %80 = vector.broadcast %79 : vector<8x1xf32> to vector<8x128xf32>
    %81 = arith.mulf %78, %80 : vector<8x128xf32>
    %82 = arith.addf %76, %81 : vector<8x128xf32>
    %c0_44 = arith.constant 0 : index
    %c12 = arith.constant 12 : index
    %c0_45 = arith.constant 0 : index
    %c0_46 = arith.constant 0 : index
    %83 = vector.load %arg2[%c0_44, %c12, %c0_45, %c0_46] : memref<1x36x8x128xf32, #tpu.memory_space<vmem>>, vector<1x1x8x128xf32>
    %84 = vector.shape_cast %83 : vector<1x1x8x128xf32> to vector<8x128xf32>
    %85 = vector.extract_strided_slice %11 {offsets = [0, 12], sizes = [8, 1], strides = [1, 1]} : vector<8x36xf32> to vector<8x1xf32>
    %86 = vector.broadcast %85 : vector<8x1xf32> to vector<8x128xf32>
    %87 = arith.mulf %84, %86 : vector<8x128xf32>
    %88 = arith.addf %82, %87 : vector<8x128xf32>
    %c0_47 = arith.constant 0 : index
    %c13 = arith.constant 13 : index
    %c0_48 = arith.constant 0 : index
    %c0_49 = arith.constant 0 : index
    %89 = vector.load %arg2[%c0_47, %c13, %c0_48, %c0_49] : memref<1x36x8x128xf32, #tpu.memory_space<vmem>>, vector<1x1x8x128xf32>
    %90 = vector.shape_cast %89 : vector<1x1x8x128xf32> to vector<8x128xf32>
    %91 = vector.extract_strided_slice %11 {offsets = [0, 13], sizes = [8, 1], strides = [1, 1]} : vector<8x36xf32> to vector<8x1xf32>
    %92 = vector.broadcast %91 : vector<8x1xf32> to vector<8x128xf32>
    %93 = arith.mulf %90, %92 : vector<8x128xf32>
    %94 = arith.addf %88, %93 : vector<8x128xf32>
    %c0_50 = arith.constant 0 : index
    %c14 = arith.constant 14 : index
    %c0_51 = arith.constant 0 : index
    %c0_52 = arith.constant 0 : index
    %95 = vector.load %arg2[%c0_50, %c14, %c0_51, %c0_52] : memref<1x36x8x128xf32, #tpu.memory_space<vmem>>, vector<1x1x8x128xf32>
    %96 = vector.shape_cast %95 : vector<1x1x8x128xf32> to vector<8x128xf32>
    %97 = vector.extract_strided_slice %11 {offsets = [0, 14], sizes = [8, 1], strides = [1, 1]} : vector<8x36xf32> to vector<8x1xf32>
    %98 = vector.broadcast %97 : vector<8x1xf32> to vector<8x128xf32>
    %99 = arith.mulf %96, %98 : vector<8x128xf32>
    %100 = arith.addf %94, %99 : vector<8x128xf32>
    %c0_53 = arith.constant 0 : index
    %c15 = arith.constant 15 : index
    %c0_54 = arith.constant 0 : index
    %c0_55 = arith.constant 0 : index
    %101 = vector.load %arg2[%c0_53, %c15, %c0_54, %c0_55] : memref<1x36x8x128xf32, #tpu.memory_space<vmem>>, vector<1x1x8x128xf32>
    %102 = vector.shape_cast %101 : vector<1x1x8x128xf32> to vector<8x128xf32>
    %103 = vector.extract_strided_slice %11 {offsets = [0, 15], sizes = [8, 1], strides = [1, 1]} : vector<8x36xf32> to vector<8x1xf32>
    %104 = vector.broadcast %103 : vector<8x1xf32> to vector<8x128xf32>
    %105 = arith.mulf %102, %104 : vector<8x128xf32>
    %106 = arith.addf %100, %105 : vector<8x128xf32>
    %c0_56 = arith.constant 0 : index
    %c16 = arith.constant 16 : index
    %c0_57 = arith.constant 0 : index
    %c0_58 = arith.constant 0 : index
    %107 = vector.load %arg2[%c0_56, %c16, %c0_57, %c0_58] : memref<1x36x8x128xf32, #tpu.memory_space<vmem>>, vector<1x1x8x128xf32>
    %108 = vector.shape_cast %107 : vector<1x1x8x128xf32> to vector<8x128xf32>
    %109 = vector.extract_strided_slice %11 {offsets = [0, 16], sizes = [8, 1], strides = [1, 1]} : vector<8x36xf32> to vector<8x1xf32>
    %110 = vector.broadcast %109 : vector<8x1xf32> to vector<8x128xf32>
    %111 = arith.mulf %108, %110 : vector<8x128xf32>
    %112 = arith.addf %106, %111 : vector<8x128xf32>
    %c0_59 = arith.constant 0 : index
    %c17 = arith.constant 17 : index
    %c0_60 = arith.constant 0 : index
    %c0_61 = arith.constant 0 : index
    %113 = vector.load %arg2[%c0_59, %c17, %c0_60, %c0_61] : memref<1x36x8x128xf32, #tpu.memory_space<vmem>>, vector<1x1x8x128xf32>
    %114 = vector.shape_cast %113 : vector<1x1x8x128xf32> to vector<8x128xf32>
    %115 = vector.extract_strided_slice %11 {offsets = [0, 17], sizes = [8, 1], strides = [1, 1]} : vector<8x36xf32> to vector<8x1xf32>
    %116 = vector.broadcast %115 : vector<8x1xf32> to vector<8x128xf32>
    %117 = arith.mulf %114, %116 : vector<8x128xf32>
    %118 = arith.addf %112, %117 : vector<8x128xf32>
    %c0_62 = arith.constant 0 : index
    %c18 = arith.constant 18 : index
    %c0_63 = arith.constant 0 : index
    %c0_64 = arith.constant 0 : index
    %119 = vector.load %arg2[%c0_62, %c18, %c0_63, %c0_64] : memref<1x36x8x128xf32, #tpu.memory_space<vmem>>, vector<1x1x8x128xf32>
    %120 = vector.shape_cast %119 : vector<1x1x8x128xf32> to vector<8x128xf32>
    %121 = vector.extract_strided_slice %11 {offsets = [0, 18], sizes = [8, 1], strides = [1, 1]} : vector<8x36xf32> to vector<8x1xf32>
    %122 = vector.broadcast %121 : vector<8x1xf32> to vector<8x128xf32>
    %123 = arith.mulf %120, %122 : vector<8x128xf32>
    %124 = arith.addf %118, %123 : vector<8x128xf32>
    %c0_65 = arith.constant 0 : index
    %c19 = arith.constant 19 : index
    %c0_66 = arith.constant 0 : index
    %c0_67 = arith.constant 0 : index
    %125 = vector.load %arg2[%c0_65, %c19, %c0_66, %c0_67] : memref<1x36x8x128xf32, #tpu.memory_space<vmem>>, vector<1x1x8x128xf32>
    %126 = vector.shape_cast %125 : vector<1x1x8x128xf32> to vector<8x128xf32>
    %127 = vector.extract_strided_slice %11 {offsets = [0, 19], sizes = [8, 1], strides = [1, 1]} : vector<8x36xf32> to vector<8x1xf32>
    %128 = vector.broadcast %127 : vector<8x1xf32> to vector<8x128xf32>
    %129 = arith.mulf %126, %128 : vector<8x128xf32>
    %130 = arith.addf %124, %129 : vector<8x128xf32>
    %c0_68 = arith.constant 0 : index
    %c20 = arith.constant 20 : index
    %c0_69 = arith.constant 0 : index
    %c0_70 = arith.constant 0 : index
    %131 = vector.load %arg2[%c0_68, %c20, %c0_69, %c0_70] : memref<1x36x8x128xf32, #tpu.memory_space<vmem>>, vector<1x1x8x128xf32>
    %132 = vector.shape_cast %131 : vector<1x1x8x128xf32> to vector<8x128xf32>
    %133 = vector.extract_strided_slice %11 {offsets = [0, 20], sizes = [8, 1], strides = [1, 1]} : vector<8x36xf32> to vector<8x1xf32>
    %134 = vector.broadcast %133 : vector<8x1xf32> to vector<8x128xf32>
    %135 = arith.mulf %132, %134 : vector<8x128xf32>
    %136 = arith.addf %130, %135 : vector<8x128xf32>
    %c0_71 = arith.constant 0 : index
    %c21 = arith.constant 21 : index
    %c0_72 = arith.constant 0 : index
    %c0_73 = arith.constant 0 : index
    %137 = vector.load %arg2[%c0_71, %c21, %c0_72, %c0_73] : memref<1x36x8x128xf32, #tpu.memory_space<vmem>>, vector<1x1x8x128xf32>
    %138 = vector.shape_cast %137 : vector<1x1x8x128xf32> to vector<8x128xf32>
    %139 = vector.extract_strided_slice %11 {offsets = [0, 21], sizes = [8, 1], strides = [1, 1]} : vector<8x36xf32> to vector<8x1xf32>
    %140 = vector.broadcast %139 : vector<8x1xf32> to vector<8x128xf32>
    %141 = arith.mulf %138, %140 : vector<8x128xf32>
    %142 = arith.addf %136, %141 : vector<8x128xf32>
    %c0_74 = arith.constant 0 : index
    %c22 = arith.constant 22 : index
    %c0_75 = arith.constant 0 : index
    %c0_76 = arith.constant 0 : index
    %143 = vector.load %arg2[%c0_74, %c22, %c0_75, %c0_76] : memref<1x36x8x128xf32, #tpu.memory_space<vmem>>, vector<1x1x8x128xf32>
    %144 = vector.shape_cast %143 : vector<1x1x8x128xf32> to vector<8x128xf32>
    %145 = vector.extract_strided_slice %11 {offsets = [0, 22], sizes = [8, 1], strides = [1, 1]} : vector<8x36xf32> to vector<8x1xf32>
    %146 = vector.broadcast %145 : vector<8x1xf32> to vector<8x128xf32>
    %147 = arith.mulf %144, %146 : vector<8x128xf32>
    %148 = arith.addf %142, %147 : vector<8x128xf32>
    %c0_77 = arith.constant 0 : index
    %c23 = arith.constant 23 : index
    %c0_78 = arith.constant 0 : index
    %c0_79 = arith.constant 0 : index
    %149 = vector.load %arg2[%c0_77, %c23, %c0_78, %c0_79] : memref<1x36x8x128xf32, #tpu.memory_space<vmem>>, vector<1x1x8x128xf32>
    %150 = vector.shape_cast %149 : vector<1x1x8x128xf32> to vector<8x128xf32>
    %151 = vector.extract_strided_slice %11 {offsets = [0, 23], sizes = [8, 1], strides = [1, 1]} : vector<8x36xf32> to vector<8x1xf32>
    %152 = vector.broadcast %151 : vector<8x1xf32> to vector<8x128xf32>
    %153 = arith.mulf %150, %152 : vector<8x128xf32>
    %154 = arith.addf %148, %153 : vector<8x128xf32>
    %c0_80 = arith.constant 0 : index
    %c24 = arith.constant 24 : index
    %c0_81 = arith.constant 0 : index
    %c0_82 = arith.constant 0 : index
    %155 = vector.load %arg2[%c0_80, %c24, %c0_81, %c0_82] : memref<1x36x8x128xf32, #tpu.memory_space<vmem>>, vector<1x1x8x128xf32>
    %156 = vector.shape_cast %155 : vector<1x1x8x128xf32> to vector<8x128xf32>
    %157 = vector.extract_strided_slice %11 {offsets = [0, 24], sizes = [8, 1], strides = [1, 1]} : vector<8x36xf32> to vector<8x1xf32>
    %158 = vector.broadcast %157 : vector<8x1xf32> to vector<8x128xf32>
    %159 = arith.mulf %156, %158 : vector<8x128xf32>
    %160 = arith.addf %154, %159 : vector<8x128xf32>
    %c0_83 = arith.constant 0 : index
    %c25 = arith.constant 25 : index
    %c0_84 = arith.constant 0 : index
    %c0_85 = arith.constant 0 : index
    %161 = vector.load %arg2[%c0_83, %c25, %c0_84, %c0_85] : memref<1x36x8x128xf32, #tpu.memory_space<vmem>>, vector<1x1x8x128xf32>
    %162 = vector.shape_cast %161 : vector<1x1x8x128xf32> to vector<8x128xf32>
    %163 = vector.extract_strided_slice %11 {offsets = [0, 25], sizes = [8, 1], strides = [1, 1]} : vector<8x36xf32> to vector<8x1xf32>
    %164 = vector.broadcast %163 : vector<8x1xf32> to vector<8x128xf32>
    %165 = arith.mulf %162, %164 : vector<8x128xf32>
    %166 = arith.addf %160, %165 : vector<8x128xf32>
    %c0_86 = arith.constant 0 : index
    %c26 = arith.constant 26 : index
    %c0_87 = arith.constant 0 : index
    %c0_88 = arith.constant 0 : index
    %167 = vector.load %arg2[%c0_86, %c26, %c0_87, %c0_88] : memref<1x36x8x128xf32, #tpu.memory_space<vmem>>, vector<1x1x8x128xf32>
    %168 = vector.shape_cast %167 : vector<1x1x8x128xf32> to vector<8x128xf32>
    %169 = vector.extract_strided_slice %11 {offsets = [0, 26], sizes = [8, 1], strides = [1, 1]} : vector<8x36xf32> to vector<8x1xf32>
    %170 = vector.broadcast %169 : vector<8x1xf32> to vector<8x128xf32>
    %171 = arith.mulf %168, %170 : vector<8x128xf32>
    %172 = arith.addf %166, %171 : vector<8x128xf32>
    %c0_89 = arith.constant 0 : index
    %c27 = arith.constant 27 : index
    %c0_90 = arith.constant 0 : index
    %c0_91 = arith.constant 0 : index
    %173 = vector.load %arg2[%c0_89, %c27, %c0_90, %c0_91] : memref<1x36x8x128xf32, #tpu.memory_space<vmem>>, vector<1x1x8x128xf32>
    %174 = vector.shape_cast %173 : vector<1x1x8x128xf32> to vector<8x128xf32>
    %175 = vector.extract_strided_slice %11 {offsets = [0, 27], sizes = [8, 1], strides = [1, 1]} : vector<8x36xf32> to vector<8x1xf32>
    %176 = vector.broadcast %175 : vector<8x1xf32> to vector<8x128xf32>
    %177 = arith.mulf %174, %176 : vector<8x128xf32>
    %178 = arith.addf %172, %177 : vector<8x128xf32>
    %c0_92 = arith.constant 0 : index
    %c28 = arith.constant 28 : index
    %c0_93 = arith.constant 0 : index
    %c0_94 = arith.constant 0 : index
    %179 = vector.load %arg2[%c0_92, %c28, %c0_93, %c0_94] : memref<1x36x8x128xf32, #tpu.memory_space<vmem>>, vector<1x1x8x128xf32>
    %180 = vector.shape_cast %179 : vector<1x1x8x128xf32> to vector<8x128xf32>
    %181 = vector.extract_strided_slice %11 {offsets = [0, 28], sizes = [8, 1], strides = [1, 1]} : vector<8x36xf32> to vector<8x1xf32>
    %182 = vector.broadcast %181 : vector<8x1xf32> to vector<8x128xf32>
    %183 = arith.mulf %180, %182 : vector<8x128xf32>
    %184 = arith.addf %178, %183 : vector<8x128xf32>
    %c0_95 = arith.constant 0 : index
    %c29 = arith.constant 29 : index
    %c0_96 = arith.constant 0 : index
    %c0_97 = arith.constant 0 : index
    %185 = vector.load %arg2[%c0_95, %c29, %c0_96, %c0_97] : memref<1x36x8x128xf32, #tpu.memory_space<vmem>>, vector<1x1x8x128xf32>
    %186 = vector.shape_cast %185 : vector<1x1x8x128xf32> to vector<8x128xf32>
    %187 = vector.extract_strided_slice %11 {offsets = [0, 29], sizes = [8, 1], strides = [1, 1]} : vector<8x36xf32> to vector<8x1xf32>
    %188 = vector.broadcast %187 : vector<8x1xf32> to vector<8x128xf32>
    %189 = arith.mulf %186, %188 : vector<8x128xf32>
    %190 = arith.addf %184, %189 : vector<8x128xf32>
    %c0_98 = arith.constant 0 : index
    %c30 = arith.constant 30 : index
    %c0_99 = arith.constant 0 : index
    %c0_100 = arith.constant 0 : index
    %191 = vector.load %arg2[%c0_98, %c30, %c0_99, %c0_100] : memref<1x36x8x128xf32, #tpu.memory_space<vmem>>, vector<1x1x8x128xf32>
    %192 = vector.shape_cast %191 : vector<1x1x8x128xf32> to vector<8x128xf32>
    %193 = vector.extract_strided_slice %11 {offsets = [0, 30], sizes = [8, 1], strides = [1, 1]} : vector<8x36xf32> to vector<8x1xf32>
    %194 = vector.broadcast %193 : vector<8x1xf32> to vector<8x128xf32>
    %195 = arith.mulf %192, %194 : vector<8x128xf32>
    %196 = arith.addf %190, %195 : vector<8x128xf32>
    %c0_101 = arith.constant 0 : index
    %c31 = arith.constant 31 : index
    %c0_102 = arith.constant 0 : index
    %c0_103 = arith.constant 0 : index
    %197 = vector.load %arg2[%c0_101, %c31, %c0_102, %c0_103] : memref<1x36x8x128xf32, #tpu.memory_space<vmem>>, vector<1x1x8x128xf32>
    %198 = vector.shape_cast %197 : vector<1x1x8x128xf32> to vector<8x128xf32>
    %199 = vector.extract_strided_slice %11 {offsets = [0, 31], sizes = [8, 1], strides = [1, 1]} : vector<8x36xf32> to vector<8x1xf32>
    %200 = vector.broadcast %199 : vector<8x1xf32> to vector<8x128xf32>
    %201 = arith.mulf %198, %200 : vector<8x128xf32>
    %202 = arith.addf %196, %201 : vector<8x128xf32>
    %c0_104 = arith.constant 0 : index
    %c32 = arith.constant 32 : index
    %c0_105 = arith.constant 0 : index
    %c0_106 = arith.constant 0 : index
    %203 = vector.load %arg2[%c0_104, %c32, %c0_105, %c0_106] : memref<1x36x8x128xf32, #tpu.memory_space<vmem>>, vector<1x1x8x128xf32>
    %204 = vector.shape_cast %203 : vector<1x1x8x128xf32> to vector<8x128xf32>
    %205 = vector.extract_strided_slice %11 {offsets = [0, 32], sizes = [8, 1], strides = [1, 1]} : vector<8x36xf32> to vector<8x1xf32>
    %206 = vector.broadcast %205 : vector<8x1xf32> to vector<8x128xf32>
    %207 = arith.mulf %204, %206 : vector<8x128xf32>
    %208 = arith.addf %202, %207 : vector<8x128xf32>
    %c0_107 = arith.constant 0 : index
    %c33 = arith.constant 33 : index
    %c0_108 = arith.constant 0 : index
    %c0_109 = arith.constant 0 : index
    %209 = vector.load %arg2[%c0_107, %c33, %c0_108, %c0_109] : memref<1x36x8x128xf32, #tpu.memory_space<vmem>>, vector<1x1x8x128xf32>
    %210 = vector.shape_cast %209 : vector<1x1x8x128xf32> to vector<8x128xf32>
    %211 = vector.extract_strided_slice %11 {offsets = [0, 33], sizes = [8, 1], strides = [1, 1]} : vector<8x36xf32> to vector<8x1xf32>
    %212 = vector.broadcast %211 : vector<8x1xf32> to vector<8x128xf32>
    %213 = arith.mulf %210, %212 : vector<8x128xf32>
    %214 = arith.addf %208, %213 : vector<8x128xf32>
    %c0_110 = arith.constant 0 : index
    %c34 = arith.constant 34 : index
    %c0_111 = arith.constant 0 : index
    %c0_112 = arith.constant 0 : index
    %215 = vector.load %arg2[%c0_110, %c34, %c0_111, %c0_112] : memref<1x36x8x128xf32, #tpu.memory_space<vmem>>, vector<1x1x8x128xf32>
    %216 = vector.shape_cast %215 : vector<1x1x8x128xf32> to vector<8x128xf32>
    %217 = vector.extract_strided_slice %11 {offsets = [0, 34], sizes = [8, 1], strides = [1, 1]} : vector<8x36xf32> to vector<8x1xf32>
    %218 = vector.broadcast %217 : vector<8x1xf32> to vector<8x128xf32>
    %219 = arith.mulf %216, %218 : vector<8x128xf32>
    %220 = arith.addf %214, %219 : vector<8x128xf32>
    %c0_113 = arith.constant 0 : index
    %c35 = arith.constant 35 : index
    %c0_114 = arith.constant 0 : index
    %c0_115 = arith.constant 0 : index
    %221 = vector.load %arg2[%c0_113, %c35, %c0_114, %c0_115] : memref<1x36x8x128xf32, #tpu.memory_space<vmem>>, vector<1x1x8x128xf32>
    %222 = vector.shape_cast %221 : vector<1x1x8x128xf32> to vector<8x128xf32>
    %223 = vector.extract_strided_slice %11 {offsets = [0, 35], sizes = [8, 1], strides = [1, 1]} : vector<8x36xf32> to vector<8x1xf32>
    %224 = vector.broadcast %223 : vector<8x1xf32> to vector<8x128xf32>
    %225 = arith.mulf %222, %224 : vector<8x128xf32>
    %226 = arith.addf %220, %225 : vector<8x128xf32>
    %c0_116 = arith.constant 0 : index
    %c0_117 = arith.constant 0 : index
    %227 = vector.load %arg5[%c0_116, %c0_117] : memref<8x8xbf16, #tpu.memory_space<vmem>>, vector<8x8xbf16>
    %228 = arith.truncf %226 : vector<8x128xf32> to vector<8x128xbf16>
    %cst_118 = arith.constant dense<0.000000e+00> : vector<8x128xf32>
    %229 = tpu.matmul %227, %228, %cst_118 {dimension_numbers = #tpu.dot_dimension_numbers<[1], [0], [0], [1], [0, 0, 1, 1], [], []>} : vector<8x8xbf16>, vector<8x128xbf16>, vector<8x128xf32> -> vector<8x128xf32>
    %c0_119 = arith.constant 0 : index
    %c0_120 = arith.constant 0 : index
    %230 = vector.load %arg6[%c0_119, %c0_120] : memref<8x1xf32, #tpu.memory_space<vmem>>, vector<8x1xf32>
    %231 = vector.broadcast %230 : vector<8x1xf32> to vector<8x128xf32>
    %232 = arith.addf %229, %231 : vector<8x128xf32>
    %c0_121 = arith.constant 0 : index
    %c0_122 = arith.constant 0 : index
    %c0_123 = arith.constant 0 : index
    %233 = vector.load %arg7[%c0_121, %c0_122, %c0_123] : memref<1x8x128xf32, #tpu.memory_space<vmem>>, vector<1x8x128xf32>
    %234 = vector.shape_cast %233 : vector<1x8x128xf32> to vector<8x128xf32>
    %235 = vector.shape_cast %232 : vector<8x128xf32> to vector<1x8x128xf32>
    tpu.vector_store %arg7[%c0_121, %c0_122, %c0_123], %235 {strides = array<i32>} : memref<1x8x128xf32, #tpu.memory_space<vmem>>, vector<1x8x128xf32>,
    return
  }
  func.func @transform_0(%arg0: i32) -> (i32, i32, i32) {
    %c0_i32 = arith.constant 0 : i32
    %c0_i32_0 = arith.constant 0 : i32
    %c0_i32_1 = arith.constant 0 : i32
    return %arg0, %c0_i32, %c0_i32_0 : i32, i32, i32
  }
  func.func @transform_1(%arg0: i32) -> (i32, i32, i32, i32) {
    %c0_i32 = arith.constant 0 : i32
    %c0_i32_0 = arith.constant 0 : i32
    %c0_i32_1 = arith.constant 0 : i32
    %c0_i32_2 = arith.constant 0 : i32
    return %arg0, %c0_i32, %c0_i32_0, %c0_i32_1 : i32, i32, i32, i32
  }
  func.func @transform_2(%arg0: i32) -> (i32, i32) {
    %c0_i32 = arith.constant 0 : i32
    %c0_i32_0 = arith.constant 0 : i32
    %c0_i32_1 = arith.constant 0 : i32
    return %c0_i32, %c0_i32_0 : i32, i32
  }
  func.func @transform_3(%arg0: i32) -> (i32, i32) {
    %c0_i32 = arith.constant 0 : i32
    %c0_i32_0 = arith.constant 0 : i32
    %c0_i32_1 = arith.constant 0 : i32
    return %c0_i32, %c0_i32_0 : i32, i32
  }
  func.func @transform_4(%arg0: i32) -> (i32, i32) {
    %c0_i32 = arith.constant 0 : i32
    %c0_i32_0 = arith.constant 0 : i32
    %c0_i32_1 = arith.constant 0 : i32
    return %c0_i32, %c0_i32_0 : i32, i32
  }
  func.func @transform_5(%arg0: i32) -> (i32, i32) {
    %c0_i32 = arith.constant 0 : i32
    %c0_i32_0 = arith.constant 0 : i32
    %c0_i32_1 = arith.constant 0 : i32
    return %c0_i32, %c0_i32_0 : i32, i32
  }
  func.func @transform_6(%arg0: i32) -> (i32, i32, i32) {
    %c0_i32 = arith.constant 0 : i32
    %c0_i32_0 = arith.constant 0 : i32
    %c0_i32_1 = arith.constant 0 : i32
    return %arg0, %c0_i32, %c0_i32_0 : i32, i32, i32
  }
}

</mosaic_0001>

<bundles_post_ra>
// kernel: forward.2
= control target key start
LH: loop header
LB: loop body
LE: loop exit
PB: predicated region body
PF: predicated region fallthrough
CT: control target
= control target key end

     0   :  { %s719_s12 = smov 0   ;;  %s721_s13 = smov 0   ;;  %s824_s0 = inlined_call_operand.vmem [shape: bf16[8,32], index: 0, kind: input, shape index: {}]   ;;  %s825_s1 = inlined_call_operand.vmem [shape: bf16[32,1792], index: 1, kind: input, shape index: {}]   ;;  %s826_s2 = inlined_call_operand.vmem [shape: f32[8,1], index: 2, kind: input, shape index: {}]   ;;  %s827_s3 = inlined_call_operand.vmem [shape: f32[8,1792], index: 3, kind: output, shape index: {}]  }
   0x1   :  { %s723_s14 = smov 0  }
   0x2 LB: > { %s575_s15 = sadd.s32 4294967295, %s694_s14   ;;  %s736_s16 = sadd.s32 1, %s694_s14   ;;  %s694_s14 = sphi %s723_s14, %s830_s14   ;;  %s690_s13 = sphi %s721_s13, %s829_s13   ;;  %s686_s12 = sphi %s719_s12, %s828_s12  }
   0x3   : > { %s38_s17 = ssub.s32 %s694_s14, %s736_s16  ;;  %s41_s18 = sadd.s32 1, %s690_s13 }
   0x4   : > { %p39_p0 = scmp.eq.s32.totalorder %s38_s17, 0  ;;  %p48_p1 = scmp.ne.s32.totalorder %s690_s13, %s686_s12 }
   0x5   : > { %p49_p2 = scmp.eq.s32.totalorder %s694_s14, 0  ;;  %p578_p4 = scmp.ge.s32.totalorder %s694_s14, 2 }
   0x6   : > { %s745_s19 = scalar_select %p39_p0, %s690_s13, %s41_s18  }
   0x7   : > { %p50_p3 = por %p49_p2, %p48_p1  ;;  %127 = sbr.rel (%p578_p4) target bundleno = 27 (0x1b), region = 24 }
   0xe   : > { %130 = sbr.rel (!%p50_p3) target bundleno = 27 (0x1b), region = 28  ;;  %s132_s20 = sand.u32 (%p50_p3), 1, %s690_s13  }
   0xf   : > { %s610_s21 = smul.u32 (%p50_p3), 28, %s694_s14 }
  0x10   : > { %s622_s22 = smul.u32 (%p50_p3), 112, %s132_s20 }
  0x11   : > { %s753_s25 = scalar_lea.vmem (%p50_p3), %s825_s1, %s610_s21 }
  0x12   : > { %v152_v0 = vld [vmem:[%s753_s25] sm:$0xff] (%p50_p3)  ;;  %v154_v1 = vld [vmem:[%s753_s25 + $0x8] sm:$0xff] (%p50_p3)  ;;  %v156_v2 = vld [vmem:[%s753_s25 + $0x10] sm:$0xff] (%p50_p3)  ;;  %s134_s26 = scalar_lea.vmem (%p50_p3), [#allocation2], %s622_s22 }
  0x13   : > { %153 = vst [vmem:[%s134_s26] sm:$0xff] (%p50_p3), %v152_v0  ;;  %155 = vst [vmem:[%s134_s26 + $0x8] sm:$0xff] (%p50_p3), %v154_v1  ;;  %v158_v3 = vld [vmem:[%s753_s25 + $0x38] sm:$0xff] (%p50_p3)  ;;  %v160_v4 = vld [vmem:[%s753_s25 + $0x40] sm:$0xff] (%p50_p3) }
  0x14   : > { %157 = vst [vmem:[%s134_s26 + $0x10] sm:$0xff] (%p50_p3), %v156_v2  ;;  %v162_v5 = vld [vmem:[%s753_s25 + $0x48] sm:$0xff] (%p50_p3)  ;;  %159 = vst [vmem:[%s134_s26 + $0x1c] sm:$0xff] (%p50_p3), %v158_v3  ;;  %v164_v6 = vld [vmem:[%s753_s25 + $0x70] sm:$0xff] (%p50_p3) }
  0x15   : > { %161 = vst [vmem:[%s134_s26 + $0x24] sm:$0xff] %v160_v4  ;;  %163 = vst [vmem:[%s134_s26 + $0x2c] sm:$0xff] %v162_v5  ;;  %v166_v7 = vld [vmem:[%s753_s25 + $0x78] sm:$0xff]  ;;  %v168_v8 = vld [vmem:[%s753_s25 + $0x80] sm:$0xff] }
  0x16   : > { %165 = vst [vmem:[%s134_s26 + $0x38] sm:$0xff] %v164_v6  ;;  %167 = vst [vmem:[%s134_s26 + $0x40] sm:$0xff] %v166_v7  ;;  %v170_v9 = vld [vmem:[%s753_s25 + $0xa8] sm:$0xff]  ;;  %v172_v10 = vld [vmem:[%s753_s25 + $0xb0] sm:$0xff] }
  0x17   : > { %169 = vst [vmem:[%s134_s26 + $0x48] sm:$0xff] %v168_v8  ;;  %v174_v11 = vld [vmem:[%s753_s25 + $0xb8] sm:$0xff]  ;;  %171 = vst [vmem:[%s134_s26 + $0x54] sm:$0xff] %v170_v9  ;;  %v582_v13 = vld [vmem:[%s753_s25 + $0x50] sm:$0xf] }
  0x18   : > { %173 = vst [vmem:[%s134_s26 + $0x5c] sm:$0xff] %v172_v10  ;;  %175 = vst [vmem:[%s134_s26 + $0x64] sm:$0xff] %v174_v11  ;;  %v580_v12 = vld [vmem:[%s753_s25 + $0x18] sm:$0xf]  ;;  %v584_v14 = vld [vmem:[%s753_s25 + $0x88] sm:$0xf] }
  0x19   : > { %581 = vst [vmem:[%s134_s26 + $0x18] sm:$0xf] %v580_v12  ;;  %583 = vst [vmem:[%s134_s26 + $0x34] sm:$0xf] %v582_v13  ;;  %v586_v15 = vld [vmem:[%s753_s25 + $0xc0] sm:$0xf] }
  0x1a   : > { %585 = vst [vmem:[%s134_s26 + $0x50] sm:$0xf] %v584_v14  ;;  %587 = vst [vmem:[%s134_s26 + $0x6c] sm:$0xf] %v586_v15 }
  0x1b PF: > { %p588_p5 = scmp.ge.s32.totalorder %s694_s14, 1  ;;  %p195_p6 = scmp.lt.s32.totalorder %s694_s14, 3 }
  0x1d   : > { %p196_p7 = pnand %p588_p5, %p195_p6 }
  0x1e   : > { %s202_s27 = sand.u32 (!%p196_p7), 1, %s686_s12   ;;  %v696_v16 = vmov (!%p196_p7), 0   ;;  %v250_v17 = vld [vmem:[%s826_s2] sm:$0xff] (!%p196_p7)  ;;  %vm328_vm0 = vcmask (!%p196_p7), 261120   ;;  %v697_v30 = vmov (!%p196_p7), 0.0   ;;  %vm698_vm1 = vmmov (!%p196_p7), 0  }
  0x1f   : > { %199 = sbr.rel (%p196_p7) target bundleno = 270 (0x10e), region = 54  ;;  %364 = vmatprep.mubr.bf16.mxu0 (!%p196_p7), %v696_v16  ;;  %405 = vmatprep.mubr.bf16.mxu1 (!%p196_p7), %v696_v16  ;;  %v233_v27 = vld [vmem:[%s824_s0] sm:$0xf] (!%p196_p7) }
  0x20   : > { %s623_s28 = smul.u32 (!%p196_p7), 112, %s202_s27  ;;  %651 = vset.pattern.permute.xlu0 (!%p196_p7), %v696_v16 }
  0x21   : > { %253 = vperm.xlu0 (!%p196_p7), %651, %v250_v17   ;;  %s226_s7 = smul.u32 (!%p196_p7), 7, %s575_s15 }
  0x22   : > { %s777_s4 = scalar_lea.vmem (!%p196_p7), [#allocation2], %s623_s28 }
  0x23   : > { %v652_v18 = vld [vmem:[%s777_s4 + $0x4] ss:$28 sps:$4 sm:$0xff] (!%p196_p7)   ;;  %v654_v19 = vld [vmem:[%s777_s4 + $0xc] ss:$28 sps:$4 sm:$0xff] (!%p196_p7)   ;;  %v658_v22 = vld [vmem:[%s777_s4 + $0x3c] ss:$28 sps:$4 sm:$0xff] (!%p196_p7)  }
  0x24   : > { %332 = vmatprep.subr.bf16.mxu0 (!%p196_p7), %v652_v18  ;;  %v656_v20 = vld [vmem:[%s777_s4] ss:$28 sps:$4 sm:$0xff] (!%p196_p7)   ;;  %v657_v21 = vld [vmem:[%s777_s4 + $0x8] ss:$28 sps:$4 sm:$0xff] (!%p196_p7)   ;;  %373 = vmatprep.subr.bf16.mxu1 (!%p196_p7), %v654_v19  ;;  %v662_v24 = vld [vmem:[%s777_s4 + $0x38] ss:$28 sps:$4 sm:$0xff] (!%p196_p7)  }
  0x25   : > { %333 = vmatpush1.bf16.msra.mxu0 (!%p196_p7), %v656_v20  ;;  %374 = vmatpush1.bf16.msra.mxu1 (!%p196_p7), %v657_v21  ;;  %v660_v23 = vld [vmem:[%s777_s4 + $0x44] ss:$28 sps:$4 sm:$0xff] (!%p196_p7)   ;;  %v666_v26 = vld [vmem:[%s777_s4 + $0x14] ss:$28 sps:$4 sm:$0xff] (!%p196_p7)   ;;  %v670_v31 = vld [vmem:[%s777_s4 + $0x4c] ss:$28 sps:$4 sm:$0xff] (!%p196_p7)  }
  0x26   : > { %334 = vmatprep.subr.bf16.mxu0 %v658_v22  ;;  %v663_v25 = vld [vmem:[%s777_s4 + $0x40] ss:$28 sps:$4 sm:$0xff]   ;;  %375 = vmatprep.subr.bf16.mxu1 %v660_v23  ;;  %v664_v28 = vld [vmem:[%s777_s4 + $0x10] ss:$28 sps:$4 sm:$0xff]   ;;  %v667_v29 = vld [vmem:[%s777_s4 + $0x18] ss:$28 sps:$4 sm:$0xff]  }
  0x27   : > { %v668_v32 = vld [vmem:[%s777_s4 + $0x48] ss:$28 sps:$4 sm:$0xff]   ;;  %v671_v33 = vld [vmem:[%s777_s4 + $0x50] ss:$28 sps:$4 sm:$0xff]   ;;  %p227_p8 = scmp.lt.s32.totalorder %s226_s7, 13 }
  0x29   : > { %335 = vmatpush1.bf16.msra.mxu0 %v662_v24  ;;  %376 = vmatpush1.bf16.msra.mxu1 %v663_v25  ;;  %s832_s7 = smov (!%p227_p8, %s226_s7), 13 }
  0x2a   : > { %414 = vmatprep.subr.bf16.mxu0 %v666_v26  ;;  %614 = vmatprep.subr.bf16.mxu1 %v697_v30  ;;  %s589_s8 = sshll.u32 %s832_s7, 3 }
  0x2b   : > { %s805_s11 = scalar_lea.vmem %s827_s3, %s589_s8 }
  0x2c   : > { %604 = vmatmul.mubr.msk.bf16.vlgmr.msra.gmra.mrb[0].mxu0 %vm328_vm0, %v233_v27  ;;  %605 = vmatmul.mubr.msk.bf16.vlgmr.msra.gmra.mrb[0].mxu1 %vm328_vm0, %v233_v27 }
  0x2d   : > { %415 = vmatpush1.bf16.msra.mxu0 %v664_v28  ;;  %615 = vmatpush3.bf16.msra.mxu1 %v667_v29 }
  0x2e   : > { %416 = vmatprep.subr.bf16.mxu0 %v670_v31  ;;  %616 = vmatprep.subr.bf16.mxu1 %v697_v30 }
  0x2f   : > { %446 = vmatprep.mubr.bf16.mxu0 %v696_v16  ;;  %618 = vmatprep.mubr.msk.bf16.mxu1 %vm698_vm1, %v697_v30 }
  0x31   : > { %417 = vmatpush1.bf16.msra.mxu0 %v668_v32  ;;  %617 = vmatpush3.bf16.msra.mxu1 %v671_v33 }
  0x34   : > { %606 = vmatmul.mubr.msk.bf16.vlgmr.msra.gmra.mrb[4].mxu0 %vm328_vm0, %v233_v27  ;;  %619 = vmatmul.mubr.msk.bf16.vlgmr.msra.gmra.mrb[4].mxu1 %vm328_vm0, %v233_v27 }
  0xa0   : > { %v254_v34 = vpop.permute.xlu0 %253 }
  0xff   : > { %v366_v35 = vpop.f32.mrb[0].mxu0  ;;  %v407_v36 = vpop.f32.mrb[0].mxu1 }
 0x100   : > { %v367_v37 = vadd.f32 %v366_v35, %v254_v34  ;;  %v408_v38 = vadd.f32 %v407_v36, %v254_v34  ;;  %v368_v39 = vpop.f32.mrb[1].mxu0  ;;  %v409_v40 = vpop.f32.mrb[1].mxu1 }
 0x101   : > { %v369_v41 = vadd.f32 %v368_v39, %v254_v34  ;;  %v410_v42 = vadd.f32 %v409_v40, %v254_v34  ;;  %v370_v43 = vpop.f32.mrb[2].mxu0  ;;  %v411_v44 = vpop.f32.mrb[2].mxu1 }
 0x102   : > { %v495_v45 = vmax.f32 %v367_v37, 0.0  ;;  %v497_v46 = vmax.f32 %v408_v38, 0.0  ;;  %v371_v47 = vpop.f32.mrb[3].mxu0  ;;  %v412_v48 = vpop.f32.mrb[3].mxu1 }
 0x103   : > { %v496_v49 = vmax.f32 %v369_v41, 0.0  ;;  %v498_v50 = vmax.f32 %v410_v42, 0.0 }
 0x104   : > { %502 = vst [vmem:[%s805_s11] sm:$0xff] %v495_v45  ;;  %504 = vst [vmem:[%s805_s11 + $0x10] sm:$0xff] %v497_v46 }
 0x105   : > { %503 = vst [vmem:[%s805_s11 + $0x8] sm:$0xff] %v496_v49  ;;  %505 = vst [vmem:[%s805_s11 + $0x18] sm:$0xff] %v498_v50 }
 0x107   : > { %v448_v51 = vpop.f32.mrb[4].mxu0  ;;  %v489_v52 = vpop.f32.mrb[4].mxu1 }
 0x108   : > { %v449_v53 = vadd.f32 %v448_v51, %v254_v34  ;;  %v490_v54 = vadd.f32 %v489_v52, %v254_v34  ;;  %v450_v55 = vpop.f32.mrb[5].mxu0  ;;  %v620_v56 = vpop.f32.mrb[5].mxu1 }
 0x109   : > { %v451_v57 = vadd.f32 %v450_v55, %v254_v34  ;;  %v452_v58 = vpop.f32.mrb[6].mxu0  ;;  %v492_v59 = vpop.f32.mrb[6].mxu1 }
 0x10a   : > { %v499_v60 = vmax.f32 %v449_v53, 0.0  ;;  %v501_v61 = vmax.f32 %v490_v54, 0.0  ;;  %v453_v62 = vpop.f32.mrb[7].mxu0  ;;  %v621_v63 = vpop.f32.mrb[7].mxu1 }
 0x10b   : > { %v500_v0 = vmax.f32 %v451_v57, 0.0 }
 0x10c   : > { %506 = vst [vmem:[%s805_s11 + $0x20] sm:$0xff] %v499_v60  ;;  %508 = vst [vmem:[%s805_s11 + $0x30] sm:$0xff] %v501_v61 }
 0x10d   : > { %507 = vst [vmem:[%s805_s11 + $0x28] sm:$0xff] %v500_v0 }
 0x10e PF: > { %p10_p9 = scmp.ge.s32.totalorder %s736_s16, 4   ;;  %s828_s12 = smov %s690_s13 }
 0x10f   : > { %s829_s13 = smov %s745_s19  ;;  %s830_s14 = smov %s736_s16 }
 0x110   :  { %12 = sbr.rel (!%p10_p9) target bundleno = 2 (0x2), region = 99 }

// kernel: forward.3
= control target key start
LH: loop header
LB: loop body
LE: loop exit
PB: predicated region body
PF: predicated region fallthrough
CT: control target
= control target key end

     0   :  { %s973_s21 = smov 0   ;;  %s1090_s0 = inlined_call_operand.vmem [shape: f32[2,24,36], index: 0, kind: input, shape index: {}]   ;;  %s1091_s1 = inlined_call_operand.vmem [shape: f32[2,36,8,128], index: 1, kind: input, shape index: {}]   ;;  %s1092_s2 = inlined_call_operand.vmem [shape: bf16[8,24], index: 2, kind: input, shape index: {}]   ;;  %s1093_s3 = inlined_call_operand.vmem [shape: f32[8,1], index: 3, kind: input, shape index: {}]   ;;  %s1094_s4 = inlined_call_operand.vmem [shape: bf16[8,8], index: 4, kind: input, shape index: {}]   ;;  %s1095_s5 = inlined_call_operand.vmem [shape: f32[8,1], index: 5, kind: input, shape index: {}]   ;;  %s1096_s6 = inlined_call_operand.vmem [shape: f32[2,8,128], index: 6, kind: output, shape index: {}]  }
   0x1 LB: > { %s741_s22 = sadd.s32 4294967295, %s898_s21   ;;  %p745_p0 = scmp.ge.s32.totalorder %s898_s21, 1  ;;  %s898_s21 = sphi %s973_s21, %s16_s21  }
   0x2   : > { %p222_p1 = scmp.lt.s32.totalorder %s898_s21, 3 }
   0x4   : > { %p223_p2 = pnand %p745_p0, %p222_p1 }
   0x5   : > { %p256_p3 = scmp.lt.s32.totalorder (!%p223_p2), %s741_s22, 1  ;;  %v900_v0 = vmov (!%p223_p2), 0.0   ;;  %vm901_vm0 = vmmov (!%p223_p2), 0   ;;  %v277_v1 = vld [vmem:[%s1093_s3] sm:$0xff] (!%p223_p2)  ;;  %v902_v2 = vmov (!%p223_p2), 0   ;;  %vm287_vm1 = vcmask (!%p223_p2), 1043456  }
   0x6   : > { %226 = sbr.rel (%p223_p2) target bundleno = 713 (0x2c9), region = 44  ;;  %793 = vmatprep.subr.bf16.mxu0 (!%p223_p2), %v900_v0  ;;  %797 = vmatprep.mubr.msk.bf16.mxu0 (!%p223_p2), %vm901_vm0, %v900_v0  ;;  %v274_v9 = vld [vmem:[%s1092_s2] sm:$0xf] (!%p223_p2)  ;;  %vm283_vm2 = vcmask (!%p223_p2), 195584   ;;  %v903_v10 = vmov (!%p223_p2), 1   ;;  %v904_v19 = vmov (!%p223_p2), 2  }
   0x7   : > { %855 = vset.pattern.permute.xlu0 (!%p223_p2), %v902_v2  ;;  %801 = vmatprep.subr.bf16.mxu1 (!%p223_p2), %v900_v0  ;;  %v905_v20 = vmov (!%p223_p2), 3   ;;  %v906_v21 = vmov (!%p223_p2), 4   ;;  %v907_v22 = vmov (!%p223_p2), 6   ;;  %v908_v23 = vmov (!%p223_p2), 5   ;;  %v622_v53 = vld [vmem:[%s1095_s5] sm:$0xff] (!%p223_p2) }
   0x8   : > { %280 = vperm.xlu0 (!%p223_p2), %855, %v277_v1   ;;  %803 = vmatprep.mubr.msk.bf16.mxu1 (!%p223_p2), %vm901_vm0, %v900_v0  ;;  %v909_v24 = vmov (!%p223_p2), 9   ;;  %v910_v25 = vmov (!%p223_p2), 7   ;;  %v911_v26 = vmov (!%p223_p2), 12   ;;  %v912_v27 = vmov (!%p223_p2), 8  }
   0x9   : > { %856 = vset.pattern.permute.xlu1 (!%p223_p2), %v903_v10  ;;  %v913_v28 = vmov (!%p223_p2), 15   ;;  %v914_v29 = vmov (!%p223_p2), 10   ;;  %v915_v30 = vmov (!%p223_p2), 18   ;;  %v916_v31 = vmov (!%p223_p2), 11  }
   0xa   : > { %v917_v32 = vmov (!%p223_p2), 21   ;;  %v918_v33 = vmov (!%p223_p2), 13   ;;  %v919_v34 = vmov (!%p223_p2), 24   ;;  %v920_v35 = vmov (!%p223_p2), 14  }
   0xb   : > { %v921_v36 = vmov (!%p223_p2), 27   ;;  %v922_v37 = vmov (!%p223_p2), 16   ;;  %v923_v38 = vmov (!%p223_p2), 30   ;;  %v924_v39 = vmov (!%p223_p2), 17  }
   0xc   : > { %v925_v40 = vmov (!%p223_p2), 33   ;;  %v926_v41 = vmov (!%p223_p2), 19   ;;  %v927_v42 = vmov (!%p223_p2), 20   ;;  %v928_v43 = vmov (!%p223_p2), 22  }
   0xd   : > { %s1098_s22 = smov (!%p256_p3, %s741_s22), 1  ;;  %v929_v44 = vmov 23   ;;  %v930_v45 = vmov 25   ;;  %v931_v46 = vmov 26   ;;  %v932_v47 = vmov 28  }
   0xe   : > { %s807_s25 = smul.u32 24, %s1098_s22  ;;  %v933_v48 = vmov 29   ;;  %v934_v49 = vmov 31   ;;  %v935_v50 = vmov 32   ;;  %v936_v51 = vmov 34   ;;  %s748_s15 = sshll.u32 %s1098_s22, 3 }
   0xf   : > { %v937_v52 = vmov 35   ;;  %s808_s7 = smul.u32 288, %s1098_s22  ;;  %vm628_vm3 = vcmask 64512   ;;  %s269_s18 = scalar_lea.vmem %s1096_s6, %s748_s15 }
  0x10   : > { %s260_s28 = scalar_lea.vmem %s1090_s0, %s807_s25 }
  0x11   : > { %v271_v3 = vld [vmem:[%s260_s28] sm:$0xff]  ;;  %v272_v4 = vld [vmem:[%s260_s28 + $0x8] sm:$0xff]  ;;  %v273_v5 = vld [vmem:[%s260_s28 + $0x10] sm:$0xff]  ;;  %s1038_s10 = scalar_lea.vmem %s1091_s1, %s808_s7 }
  0x12   : > { %v275_v6 = vpack.c.bf16 %v272_v4, %v271_v3  ;;  %v276_v7 = vpack.c.bf16 %v273_v5, %v273_v5  ;;  %v750_v54 = vld [vmem:[%s1038_s10 + $0x8] sm:$0xff]  ;;  %v333_v55 = vld [vmem:[%s1038_s10] sm:$0xff]  ;;  %v751_v60 = vld [vmem:[%s1038_s10 + $0x10] sm:$0xff] }
  0x14   : > { %794 = vmatpush3.bf16.msra.mxu0 %v275_v6  ;;  %v289_v8 = vsel %vm287_vm1, %v276_v7, 0 }
  0x15   : > { %795 = vmatprep.subr.bf16.mxu0 %v900_v0  ;;  %v752_v0 = vld [vmem:[%s1038_s10 + $0x18] sm:$0xff] }
  0x18   : > { %796 = vmatpush3.bf16.msra.mxu0 %v289_v8  ;;  %v754_v8 = vld [vmem:[%s1038_s10 + $0x28] sm:$0xff] }
  0x1b   : > { %798 = vmatmul.mubr.msk.bf16.vlgmr.msra.gmra.mrb[0].mxu0 %vm283_vm2, %v274_v9 }
  0x87   : > { %v281_v11 = vpop.permute.xlu0 %280 }
  0xee   : > { %v325_v12 = vpop.f32.mrb[0].mxu0 }
  0xef   : > { %v326_v13 = vadd.f32 %v325_v12, %v281_v11  ;;  %v799_v14 = vpop.f32.mrb[1].mxu0  ;;  %v755_v12 = vld [vmem:[%s1038_s10 + $0x30] sm:$0xff] }
  0xf0   : > { %v328_v15 = vpop.f32.mrb[2].mxu0 }
  0xf1   : > { %v331_v16 = vadd.f32 %v326_v13, %v271_v3  ;;  %v800_v17 = vpop.f32.mrb[3].mxu0  ;;  %v753_v3 = vld [vmem:[%s1038_s10 + $0x20] sm:$0xff]  ;;  %v756_v15 = vld [vmem:[%s1038_s10 + $0x38] sm:$0xff] }
  0xf3   : > { %v995_v18 = vmax.f32 %v331_v16, 0.0 }
  0xf5   : > { %343 = vperm.xlu1 %856, %v995_v18   ;;  %336 = vperm.xlu0 %855, %v995_v18  }
  0xf9   : > { %857 = vset.pattern.permute.xlu1 %v904_v19  ;;  %858 = vset.pattern.permute.xlu0 %v905_v20  ;;  %v757_v20 = vld [vmem:[%s1038_s10 + $0x40] sm:$0xff] }
  0xfa   : > { %351 = vperm.xlu1 %857, %v995_v18   ;;  %359 = vperm.xlu0 %858, %v995_v18  }
  0xfe   : > { %859 = vset.pattern.permute.xlu1 %v906_v21  ;;  %861 = vset.pattern.permute.xlu0 %v907_v22 }
  0xff   : > { %367 = vperm.xlu1 %859, %v995_v18   ;;  %383 = vperm.xlu0 %861, %v995_v18  }
 0x103   : > { %860 = vset.pattern.permute.xlu1 %v908_v23  ;;  %864 = vset.pattern.permute.xlu0 %v909_v24  ;;  %v758_v24 = vld [vmem:[%s1038_s10 + $0x48] sm:$0xff] }
 0x104   : > { %375 = vperm.xlu1 %860, %v995_v18   ;;  %407 = vperm.xlu0 %864, %v995_v18  }
 0x108   : > { %862 = vset.pattern.permute.xlu1 %v910_v25  ;;  %867 = vset.pattern.permute.xlu0 %v911_v26 }
 0x109   : > { %391 = vperm.xlu1 %862, %v995_v18   ;;  %431 = vperm.xlu0 %867, %v995_v18  }
 0x10d   : > { %863 = vset.pattern.permute.xlu1 %v912_v27  ;;  %870 = vset.pattern.permute.xlu0 %v913_v28  ;;  %v759_v27 = vld [vmem:[%s1038_s10 + $0x50] sm:$0xff] }
 0x10e   : > { %399 = vperm.xlu1 %863, %v995_v18   ;;  %455 = vperm.xlu0 %870, %v995_v18  }
 0x112   : > { %865 = vset.pattern.permute.xlu1 %v914_v29  ;;  %873 = vset.pattern.permute.xlu0 %v915_v30 }
 0x113   : > { %415 = vperm.xlu1 %865, %v995_v18   ;;  %479 = vperm.xlu0 %873, %v995_v18  }
 0x117   : > { %866 = vset.pattern.permute.xlu1 %v916_v31  ;;  %876 = vset.pattern.permute.xlu0 %v917_v32  ;;  %v760_v32 = vld [vmem:[%s1038_s10 + $0x58] sm:$0xff] }
 0x118   : > { %423 = vperm.xlu1 %866, %v995_v18   ;;  %503 = vperm.xlu0 %876, %v995_v18  }
 0x11c   : > { %868 = vset.pattern.permute.xlu1 %v918_v33  ;;  %879 = vset.pattern.permute.xlu0 %v919_v34 }
 0x11d   : > { %439 = vperm.xlu1 %868, %v995_v18   ;;  %527 = vperm.xlu0 %879, %v995_v18  }
 0x121   : > { %869 = vset.pattern.permute.xlu1 %v920_v35  ;;  %882 = vset.pattern.permute.xlu0 %v921_v36  ;;  %v761_v36 = vld [vmem:[%s1038_s10 + $0x60] sm:$0xff] }
 0x122   : > { %447 = vperm.xlu1 %869, %v995_v18   ;;  %551 = vperm.xlu0 %882, %v995_v18  }
 0x126   : > { %871 = vset.pattern.permute.xlu1 %v922_v37  ;;  %885 = vset.pattern.permute.xlu0 %v923_v38 }
 0x127   : > { %463 = vperm.xlu1 %871, %v995_v18   ;;  %575 = vperm.xlu0 %885, %v995_v18  }
 0x12b   : > { %872 = vset.pattern.permute.xlu1 %v924_v39  ;;  %888 = vset.pattern.permute.xlu0 %v925_v40  ;;  %v762_v39 = vld [vmem:[%s1038_s10 + $0x68] sm:$0xff] }
 0x12c   : > { %471 = vperm.xlu1 %872, %v995_v18   ;;  %599 = vperm.xlu0 %888, %v995_v18  }
 0x130   : > { %874 = vset.pattern.permute.xlu1 %v926_v41  ;;  %891 = vset.pattern.permute.xlu0 %v902_v2 }
 0x131   : > { %487 = vperm.xlu1 %874, %v995_v18   ;;  %625 = vperm.xlu0 %891, %v622_v53  }
 0x135   : > { %875 = vset.pattern.permute.xlu1 %v927_v42 }
 0x136   : > { %495 = vperm.xlu1 %875, %v995_v18  }
 0x13a   : > { %877 = vset.pattern.permute.xlu1 %v928_v43 }
 0x13b   : > { %511 = vperm.xlu1 %877, %v995_v18  }
 0x13f   : > { %878 = vset.pattern.permute.xlu1 %v929_v44  ;;  %v763_v44 = vld [vmem:[%s1038_s10 + $0x70] sm:$0xff] }
 0x140   : > { %519 = vperm.xlu1 %878, %v995_v18  }
 0x144   : > { %880 = vset.pattern.permute.xlu1 %v930_v45 }
 0x145   : > { %535 = vperm.xlu1 %880, %v995_v18  }
 0x149   : > { %881 = vset.pattern.permute.xlu1 %v931_v46 }
 0x14a   : > { %543 = vperm.xlu1 %881, %v995_v18  }
 0x14e   : > { %883 = vset.pattern.permute.xlu1 %v932_v47 }
 0x14f   : > { %559 = vperm.xlu1 %883, %v995_v18  }
 0x153   : > { %884 = vset.pattern.permute.xlu1 %v933_v48  ;;  %v764_v48 = vld [vmem:[%s1038_s10 + $0x78] sm:$0xff] }
 0x154   : > { %567 = vperm.xlu1 %884, %v995_v18  }
 0x158   : > { %886 = vset.pattern.permute.xlu1 %v934_v49 }
 0x159   : > { %583 = vperm.xlu1 %886, %v995_v18  }
 0x15d   : > { %887 = vset.pattern.permute.xlu1 %v935_v50 }
 0x15e   : > { %591 = vperm.xlu1 %887, %v995_v18  }
 0x162   : > { %889 = vset.pattern.permute.xlu1 %v936_v51  ;;  %v765_v51 = vld [vmem:[%s1038_s10 + $0x80] sm:$0xff] }
 0x163   : > { %607 = vperm.xlu1 %889, %v995_v18  }
 0x167   : > { %890 = vset.pattern.permute.xlu1 %v937_v52 }
 0x168   : > { %615 = vperm.xlu1 %890, %v995_v18  }
 0x174   : > { %v344_v56 = vpop.permute.xlu1 %343  ;;  %v337_v57 = vpop.permute.xlu0 %336 }
 0x175   : > { %v346_v58 = vmul.f32 %v750_v54, %v344_v56  ;;  %v339_v59 = vmul.f32 %v337_v57, %v333_v55  ;;  %v766_v56 = vld [vmem:[%s1038_s10 + $0x88] sm:$0xff] }
 0x177   : > { %v347_v62 = vadd.f32 %v346_v58, %v339_v59 }
 0x179   : > { %v352_v61 = vpop.permute.xlu1 %351  ;;  %v360_v1 = vpop.permute.xlu0 %359 }
 0x17a   : > { %v354_v63 = vmul.f32 %v751_v60, %v352_v61  ;;  %v362_v4 = vmul.f32 %v752_v0, %v360_v1  ;;  %v767_v60 = vld [vmem:[%s1038_s10 + $0x90] sm:$0xff] }
 0x17c   : > { %v355_v2 = vadd.f32 %v354_v63, %v347_v62  ;;  %v768_v63 = vld [vmem:[%s1038_s10 + $0x98] sm:$0xff] }
 0x17e   : > { %v368_v5 = vpop.permute.xlu1 %367  ;;  %v363_v6 = vadd.f32 %v362_v4, %v355_v2  ;;  %v384_v13 = vpop.permute.xlu0 %383  ;;  %v769_v4 = vld [vmem:[%s1038_s10 + $0xa0] sm:$0xff] }
 0x17f   : > { %v370_v7 = vmul.f32 %v753_v3, %v368_v5  ;;  %v386_v16 = vmul.f32 %v755_v12, %v384_v13 }
 0x181   : > { %v371_v10 = vadd.f32 %v370_v7, %v363_v6 }
 0x183   : > { %v376_v9 = vpop.permute.xlu1 %375  ;;  %v408_v25 = vpop.permute.xlu0 %407 }
 0x184   : > { %v378_v11 = vmul.f32 %v754_v8, %v376_v9  ;;  %v410_v28 = vmul.f32 %v758_v24, %v408_v25  ;;  %v770_v8 = vld [vmem:[%s1038_s10 + $0xa8] sm:$0xff] }
 0x186   : > { %v379_v14 = vadd.f32 %v378_v11, %v371_v10  ;;  %v771_v11 = vld [vmem:[%s1038_s10 + $0xb0] sm:$0xff] }
 0x188   : > { %v392_v17 = vpop.permute.xlu1 %391  ;;  %v387_v18 = vadd.f32 %v386_v16, %v379_v14  ;;  %v432_v37 = vpop.permute.xlu0 %431  ;;  %v772_v16 = vld [vmem:[%s1038_s10 + $0xb8] sm:$0xff] }
 0x189   : > { %v394_v19 = vmul.f32 %v756_v15, %v392_v17  ;;  %v434_v40 = vmul.f32 %v761_v36, %v432_v37 }
 0x18b   : > { %v395_v22 = vadd.f32 %v394_v19, %v387_v18 }
 0x18d   : > { %v400_v21 = vpop.permute.xlu1 %399  ;;  %v456_v49 = vpop.permute.xlu0 %455 }
 0x18e   : > { %v402_v23 = vmul.f32 %v757_v20, %v400_v21  ;;  %v458_v52 = vmul.f32 %v764_v48, %v456_v49  ;;  %v773_v20 = vld [vmem:[%s1038_s10 + $0xc0] sm:$0xff] }
 0x190   : > { %v403_v26 = vadd.f32 %v402_v23, %v395_v22  ;;  %v774_v23 = vld [vmem:[%s1038_s10 + $0xc8] sm:$0xff] }
 0x192   : > { %v416_v29 = vpop.permute.xlu1 %415  ;;  %v411_v30 = vadd.f32 %v410_v28, %v403_v26  ;;  %v480_v61 = vpop.permute.xlu0 %479  ;;  %v775_v28 = vld [vmem:[%s1038_s10 + $0xd0] sm:$0xff] }
 0x193   : > { %v418_v31 = vmul.f32 %v759_v27, %v416_v29  ;;  %v482_v0 = vmul.f32 %v767_v60, %v480_v61 }
 0x195   : > { %v419_v34 = vadd.f32 %v418_v31, %v411_v30 }
 0x197   : > { %v424_v33 = vpop.permute.xlu1 %423  ;;  %v504_v9 = vpop.permute.xlu0 %503 }
 0x198   : > { %v426_v35 = vmul.f32 %v760_v32, %v424_v33  ;;  %v506_v12 = vmul.f32 %v770_v8, %v504_v9  ;;  %v776_v32 = vld [vmem:[%s1038_s10 + $0xd8] sm:$0xff] }
 0x19a   : > { %v427_v38 = vadd.f32 %v426_v35, %v419_v34  ;;  %v777_v35 = vld [vmem:[%s1038_s10 + $0xe0] sm:$0xff] }
 0x19c   : > { %v440_v41 = vpop.permute.xlu1 %439  ;;  %v435_v42 = vadd.f32 %v434_v40, %v427_v38  ;;  %v528_v21 = vpop.permute.xlu0 %527  ;;  %v778_v40 = vld [vmem:[%s1038_s10 + $0xe8] sm:$0xff] }
 0x19d   : > { %v442_v43 = vmul.f32 %v762_v39, %v440_v41  ;;  %v530_v24 = vmul.f32 %v773_v20, %v528_v21 }
 0x19f   : > { %v443_v46 = vadd.f32 %v442_v43, %v435_v42 }
 0x1a1   : > { %v448_v45 = vpop.permute.xlu1 %447  ;;  %v552_v33 = vpop.permute.xlu0 %551 }
 0x1a2   : > { %v450_v47 = vmul.f32 %v763_v44, %v448_v45  ;;  %v554_v36 = vmul.f32 %v776_v32, %v552_v33  ;;  %v779_v44 = vld [vmem:[%s1038_s10 + $0xf0] sm:$0xff] }
 0x1a4   : > { %v451_v50 = vadd.f32 %v450_v47, %v443_v46  ;;  %v780_v47 = vld [vmem:[%s1038_s10 + $0xf8] sm:$0xff] }
 0x1a6   : > { %v464_v53 = vpop.permute.xlu1 %463  ;;  %v459_v54 = vadd.f32 %v458_v52, %v451_v50  ;;  %v576_v45 = vpop.permute.xlu0 %575  ;;  %v781_v52 = vld [vmem:[%s1038_s10 + $0x100] sm:$0xff] }
 0x1a7   : > { %v466_v55 = vmul.f32 %v765_v51, %v464_v53  ;;  %v578_v48 = vmul.f32 %v779_v44, %v576_v45 }
 0x1a9   : > { %v467_v58 = vadd.f32 %v466_v55, %v459_v54 }
 0x1ab   : > { %v472_v57 = vpop.permute.xlu1 %471 }
 0x1ac   : > { %v474_v59 = vmul.f32 %v766_v56, %v472_v57  ;;  %v782_v56 = vld [vmem:[%s1038_s10 + $0x108] sm:$0xff]  ;;  %v600_v57 = vpop.permute.xlu0 %599 }
 0x1ad   : > { %v602_v60 = vmul.f32 %v782_v56, %v600_v57 }
 0x1ae   : > { %v475_v62 = vadd.f32 %v474_v59, %v467_v58  ;;  %v783_v59 = vld [vmem:[%s1038_s10 + $0x110] sm:$0xff] }
 0x1b0   : > { %v488_v1 = vpop.permute.xlu1 %487  ;;  %v483_v2 = vadd.f32 %v482_v0, %v475_v62  ;;  %v784_v0 = vld [vmem:[%s1038_s10 + $0x118] sm:$0xff]  ;;  %v626_v8 = vpop.permute.xlu0 %625 }
 0x1b1   : > { %v490_v3 = vmul.f32 %v768_v63, %v488_v1 }
 0x1b3   : > { %v491_v6 = vadd.f32 %v490_v3, %v483_v2 }
 0x1b5   : > { %v496_v5 = vpop.permute.xlu1 %495 }
 0x1b6   : > { %v498_v7 = vmul.f32 %v769_v4, %v496_v5 }
 0x1b8   : > { %v499_v10 = vadd.f32 %v498_v7, %v491_v6  ;;  %v620_v7 = vld [vmem:[%s1094_s4] sm:$0xf] }
 0x1ba   : > { %v512_v13 = vpop.permute.xlu1 %511  ;;  %v507_v14 = vadd.f32 %v506_v12, %v499_v10 }
 0x1bb   : > { %v514_v15 = vmul.f32 %v771_v11, %v512_v13 }
 0x1bd   : > { %v515_v18 = vadd.f32 %v514_v15, %v507_v14 }
 0x1bf   : > { %v520_v17 = vpop.permute.xlu1 %519 }
 0x1c0   : > { %v522_v19 = vmul.f32 %v772_v16, %v520_v17 }
 0x1c2   : > { %v523_v22 = vadd.f32 %v522_v19, %v515_v18 }
 0x1c4   : > { %v536_v25 = vpop.permute.xlu1 %535  ;;  %v531_v26 = vadd.f32 %v530_v24, %v523_v22 }
 0x1c5   : > { %v538_v27 = vmul.f32 %v774_v23, %v536_v25 }
 0x1c7   : > { %v539_v30 = vadd.f32 %v538_v27, %v531_v26 }
 0x1c9   : > { %v544_v29 = vpop.permute.xlu1 %543 }
 0x1ca   : > { %v546_v31 = vmul.f32 %v775_v28, %v544_v29 }
 0x1cc   : > { %v547_v34 = vadd.f32 %v546_v31, %v539_v30 }
 0x1ce   : > { %v560_v37 = vpop.permute.xlu1 %559  ;;  %v555_v38 = vadd.f32 %v554_v36, %v547_v34 }
 0x1cf   : > { %v562_v39 = vmul.f32 %v777_v35, %v560_v37 }
 0x1d1   : > { %v563_v42 = vadd.f32 %v562_v39, %v555_v38 }
 0x1d3   : > { %v568_v41 = vpop.permute.xlu1 %567 }
 0x1d4   : > { %v570_v43 = vmul.f32 %v778_v40, %v568_v41 }
 0x1d6   : > { %v571_v46 = vadd.f32 %v570_v43, %v563_v42 }
 0x1d8   : > { %v584_v49 = vpop.permute.xlu1 %583  ;;  %v579_v50 = vadd.f32 %v578_v48, %v571_v46 }
 0x1d9   : > { %v586_v51 = vmul.f32 %v780_v47, %v584_v49 }
 0x1db   : > { %v587_v54 = vadd.f32 %v586_v51, %v579_v50 }
 0x1dd   : > { %v592_v53 = vpop.permute.xlu1 %591 }
 0x1de   : > { %v594_v55 = vmul.f32 %v781_v52, %v592_v53 }
 0x1e0   : > { %v595_v58 = vadd.f32 %v594_v55, %v587_v54 }
 0x1e2   : > { %v608_v61 = vpop.permute.xlu1 %607  ;;  %v603_v62 = vadd.f32 %v602_v60, %v595_v58 }
 0x1e3   : > { %v610_v63 = vmul.f32 %v783_v59, %v608_v61 }
 0x1e5   : > { %v611_v2 = vadd.f32 %v610_v63, %v603_v62 }
 0x1e7   : > { %v616_v1 = vpop.permute.xlu1 %615 }
 0x1e8   : > { %v618_v3 = vmul.f32 %v784_v0, %v616_v1 }
 0x1ea   : > { %v619_v4 = vadd.f32 %v618_v3, %v611_v2 }
 0x1ec   : > { %v621_v5 = vpack.c.bf16 %v619_v4, %v619_v4 }
 0x1ee   : > { %v633_v6 = vsel %vm287_vm1, %v621_v5, 0 }
 0x1ef   : > { %802 = vmatpush3.bf16.msra.mxu1 %v633_v6 }
 0x1f2   : > { %804 = vmatmul.mubr.msk.bf16.vlgmr.msra.gmra.mrb[0].mxu1 %vm628_vm3, %v620_v7 }
 0x2c5   : > { %v669_v9 = vpop.f32.mrb[0].mxu1 }
 0x2c6   : > { %v670_v10 = vadd.f32 %v669_v9, %v626_v8  ;;  %v805_v11 = vpop.f32.mrb[1].mxu1 }
 0x2c7   : > { %v672_v12 = vpop.f32.mrb[2].mxu1 }
 0x2c8   : > { %675 = vst [vmem:[%s269_s18] sm:$0xff] %v670_v10  ;;  %v806_v13 = vpop.f32.mrb[3].mxu1 }
 0x2c9 PF: > { %s16_s21 = sadd.s32 1, %s898_s21  }
 0x2ca   : > { %p13_p4 = scmp.ge.s32.totalorder %s16_s21, 4  }
 0x2cc   :  { %15 = sbr.rel (!%p13_p4) target bundleno = 1 (0x1), region = 112 }

</bundles_post_ra>
